<compile_context>
chip_gen: v7x
topology: tpu7x:2x2x1
jax: 0.10.0
libtpu: 0.0.40
codegen_flags: <defaults>
</compile_context>

<pallas_src>
import jax
import jax.numpy as jnp
from jax.experimental import pallas as pl
from jax.experimental.pallas import tpu as pltpu


def _round_up(n: int, m: int) -> int:
    return ((n + m - 1) // m) * m


# ---------------------------------------------------------------------------
# Pallas kernel: fused 3x3 conv (pad=1, stride=1) + bias + ReLU, whole batch.
# ---------------------------------------------------------------------------
def _make_conv3x3_relu_kernel(B: int, C: int, OutC: int, H: int, W: int,
                              M: int, XBUF: int):
    L = H * W

    def kernel(x_ref, w_ref, b_ref, o_ref, xbuf):
        # x_ref: (B*C, L)      NCHW image, flat over (H, W)
        # w_ref: (OutC, C*9)   torch OIHW weight reshaped; col = c*9 + kh*3 + kw
        # b_ref: (OutC, 1)
        # o_ref: (B*OutC, L)   NCHW-flat output (bitcasts back to (B,OutC,H,W))
        # xbuf:  (B*C, XBUF)   VMEM scratch: zero margins + image at lane offset M

        # --- stage the image into the zero-margined buffer (aligned copy-in) ---
        xbuf[...] = jnp.zeros_like(xbuf)
        xbuf[:, M:M + L] = x_ref[...]

        w = w_ref[...]                                             # (OutC, C*9)
        bias = jnp.broadcast_to(b_ref[...], (OutC, L)).astype(jnp.float32)

        # Lane masks for the image-column (width) boundary.  Height boundaries
        # are handled automatically by the zero margins of xbuf.
        lane_w = jax.lax.broadcasted_iota(jnp.int32, (B * C, L), 1) % W
        mask_lo = (lane_w != 0).astype(jnp.float32)        # kw == 0 (needs w-1)
        mask_hi = (lane_w != W - 1).astype(jnp.float32)    # kw == 2 (needs w+1)

        # Partial accumulators: one per (batch, kh) -> 6 independent 12-deep
        # chains instead of one 36-deep chain (VALU latency hiding).
        parts = [[jnp.zeros((OutC, L), jnp.float32) for _ in range(3)]
                 for _ in range(B)]

        for kh in range(3):
            for kw in range(3):
                d = (kh - 1) * W + (kw - 1)                 # flat tap offset
                tap = xbuf[:, M + d: M + d + L]             # (B*C, L) shifted view
                if kw == 0:
                    tap = tap * mask_lo
                elif kw == 2:
                    tap = tap * mask_hi
                for b in range(B):
                    for c in range(C):
                        col = c * 9 + kh * 3 + kw
                        # Outer-product MAC on the VPU:
                        # (OutC, 1) * (1, L) -> (OutC, L)
                        parts[b][kh] = parts[b][kh] + (
                            w[:, col:col + 1] * tap[b * C + c: b * C + c + 1, :])

        for b in range(B):
            out_b = jnp.maximum(bias + parts[b][0] + parts[b][1] + parts[b][2],
                                0.0)
            o_ref[b * OutC:(b + 1) * OutC, :] = out_b.astype(o_ref.dtype)

    return kernel


def conv3x3_relu(x, weight, bias):
    """Fused Conv2d(k=3, stride=1, pad=1) + bias + ReLU.

    x:      (B, C, H, W)     f32, NCHW (torch layout)
    weight: (OutC, C, 3, 3)  f32, torch OIHW layout
    bias:   (OutC,)          f32
    returns (B, OutC, H, W)  f32, NCHW
    """
    B, C, H, W = x.shape
    OutC = weight.shape[0]
    L = H * W

    # Zero-margin staging buffer geometry.  Taps need lane offsets in
    # [-(W+1), +(W+1)] around the image; M = 128 keeps the copy-in vreg-aligned.
    M = 128
    XBUF = _round_up(M + L + W + 1, 128)
    assert M >= W + 1 and XBUF >= M + L + W + 1, "tap margin invariant violated"

    # Bitcast-only reshapes (contiguous leading/trailing dim merges): no copies,
    # no extra HBM round trips, no padding ops.
    x_flat = x.reshape(B * C, L)
    w2 = weight.reshape(OutC, C * 9)
    b2 = bias.reshape(OutC, 1)

    kernel = _make_conv3x3_relu_kernel(B=B, C=C, OutC=OutC, H=H, W=W,
                                       M=M, XBUF=XBUF)

    out_flat = pl.pallas_call(
        kernel,
        out_shape=jax.ShapeDtypeStruct((B * OutC, L), jnp.float32),
        grid_spec=pltpu.PrefetchScalarGridSpec(
            num_scalar_prefetch=0,
            grid=(1,),                                   # whole batch, one step
            in_specs=[
                pl.BlockSpec((B * C, L), lambda i: (0, 0)),      # image
                pl.BlockSpec((OutC, C * 9), lambda i: (0, 0)),   # weights
                pl.BlockSpec((OutC, 1), lambda i: (0, 0)),       # bias
            ],
            out_specs=pl.BlockSpec((B * OutC, L), lambda i: (0, 0)),
            scratch_shapes=[pltpu.VMEM((B * C, XBUF), jnp.float32)],
        ),
        compiler_params=pltpu.CompilerParams(
            dimension_semantics=("arbitrary",),
        ),
    )(x_flat, w2, b2)

    # Bitcast back to NCHW — no slicing / strided copy epilogue.
    return out_flat.reshape(B, OutC, H, W)


# ---------------------------------------------------------------------------
# FeatureExtractor forward
# ---------------------------------------------------------------------------
def feature_extractor_forward(x, weight, bias):
    """Reproduces FeatureExtractor.forward: returns {'head': submodule(x)}."""
    head = conv3x3_relu(x, weight, bias)
    outputs = {"head": head}
    return outputs


# ---------------------------------------------------------------------------
if __name__ == "__main__":
    key = jax.random.PRNGKey(0)
    kx, kw, kb = jax.random.split(key, 3)

    B, C, H, W = 2, 4, 16, 16
    OutC = 8

    x = jax.random.normal(kx, (B, C, H, W), dtype=jnp.float32)
    weight = 0.1 * jax.random.normal(kw, (OutC, C, 3, 3), dtype=jnp.float32)
    bias = 0.1 * jax.random.normal(kb, (OutC,), dtype=jnp.float32)

    outputs = jax.jit(feature_extractor_forward)(x, weight, bias)
    head = jax.block_until_ready(outputs["head"])
    assert head.shape == (B, OutC, H, W)

    # Pure-JAX reference (same semantics as torch.nn.Conv2d(pad=1) + ReLU).
    ref = jax.lax.conv_general_dilated(
        x, weight, window_strides=(1, 1), padding=((1, 1), (1, 1)),
        dimension_numbers=("NCHW", "OIHW", "NCHW"))
    ref = jnp.maximum(ref + bias.reshape(1, OutC, 1, 1), 0.0)
    assert jnp.allclose(head, ref, atol=1e-4, rtol=1e-4)

    print("KERNEL_OK")
</pallas_src>

<mosaic_0001>
module attributes {stable_mosaic.version = 11 : i64} {
  func.func @kernel(%arg0: i32, %arg1: memref<8x256xf32, #tpu.memory_space<vmem>>, %arg2: memref<8x36xf32, #tpu.memory_space<vmem>>, %arg3: memref<8x1xf32, #tpu.memory_space<vmem>>, %arg4: memref<16x256xf32, #tpu.memory_space<vmem>>, %arg5: memref<8x512xf32, #tpu.memory_space<vmem>>) attributes {dimension_semantics = [#tpu.dimension_semantics<arbitrary>], iteration_bounds = array<i64: 1>, scalar_prefetch = 0 : i64, scratch_operands = 1 : i64, tpu.core_type = #tpu.core_type<tc>, window_params = [{pipeline_mode = #tpu.pipeline_mode<synchronous>, transform_indices = @transform_0, window_bounds = array<i64: 8, 256>}, {pipeline_mode = #tpu.pipeline_mode<synchronous>, transform_indices = @transform_1, window_bounds = array<i64: 8, 36>}, {pipeline_mode = #tpu.pipeline_mode<synchronous>, transform_indices = @transform_2, window_bounds = array<i64: 8, 1>}, {pipeline_mode = #tpu.pipeline_mode<synchronous>, transform_indices = @transform_3, window_bounds = array<i64: 16, 256>}]} {
    %cst = arith.constant 0.000000e+00 : f32
    %0 = vector.broadcast %cst : f32 to vector<8x512xf32>
    %c0 = arith.constant 0 : index
    %c0_0 = arith.constant 0 : index
    %1 = vector.load %arg5[%c0, %c0_0] : memref<8x512xf32, #tpu.memory_space<vmem>>, vector<8x512xf32>
    tpu.vector_store %arg5[%c0, %c0_0], %0 {strides = array<i32>} : memref<8x512xf32, #tpu.memory_space<vmem>>, vector<8x512xf32>,
    %c0_1 = arith.constant 0 : index
    %c0_2 = arith.constant 0 : index
    %2 = vector.load %arg1[%c0_1, %c0_2] : memref<8x256xf32, #tpu.memory_space<vmem>>, vector<8x256xf32>
    %c0_3 = arith.constant 0 : index
    %c128 = arith.constant 128 : index
    %3 = vector.load %arg5[%c0_3, %c128] : memref<8x512xf32, #tpu.memory_space<vmem>>, vector<8x256xf32>
    tpu.vector_store %arg5[%c0_3, %c128], %2 {strides = array<i32>} : memref<8x512xf32, #tpu.memory_space<vmem>>, vector<8x256xf32>,
    %c0_4 = arith.constant 0 : index
    %c0_5 = arith.constant 0 : index
    %4 = vector.load %arg2[%c0_4, %c0_5] : memref<8x36xf32, #tpu.memory_space<vmem>>, vector<8x36xf32>
    %c0_6 = arith.constant 0 : index
    %c0_7 = arith.constant 0 : index
    %5 = vector.load %arg3[%c0_6, %c0_7] : memref<8x1xf32, #tpu.memory_space<vmem>>, vector<8x1xf32>
    %6 = vector.shape_cast %5 : vector<8x1xf32> to vector<8x1xf32>
    %7 = vector.broadcast %6 : vector<8x1xf32> to vector<8x256xf32>
    %8 = tpu.iota {dimensions = array<i32: 1>} : vector<8x256xi32>
    %c16_i32 = arith.constant 16 : i32
    %c0_i32 = arith.constant 0 : i32
    %9 = arith.cmpi eq, %c16_i32, %c0_i32 : i32
    %c1_i32 = arith.constant 1 : i32
    %10 = arith.select %9, %c1_i32, %c16_i32 : i32
    %11 = vector.broadcast %10 : i32 to vector<8x256xi32>
    %12 = arith.remsi %8, %11 : vector<8x256xi32>
    %c0_i32_8 = arith.constant 0 : i32
    %13 = vector.broadcast %c0_i32_8 : i32 to vector<8x256xi32>
    %14 = arith.cmpi ne, %12, %13 : vector<8x256xi32>
    %c0_i32_9 = arith.constant 0 : i32
    %15 = vector.broadcast %c0_i32_9 : i32 to vector<8x256xi32>
    %16 = arith.cmpi slt, %12, %15 : vector<8x256xi32>
    %c0_i32_10 = arith.constant 0 : i32
    %17 = arith.cmpi slt, %10, %c0_i32_10 : i32
    %18 = vector.broadcast %17 : i1 to vector<8x256xi1>
    %19 = vector.broadcast %18 : vector<8x256xi1> to vector<8x256xi1>
    %20 = arith.xori %16, %19 : vector<8x256xi1>
    %21 = arith.andi %20, %14 : vector<8x256xi1>
    %22 = vector.broadcast %10 : i32 to vector<8x256xi32>
    %23 = arith.addi %12, %22 : vector<8x256xi32>
    %24 = arith.select %21, %23, %12 : vector<8x256xi1>, vector<8x256xi32>
    %c0_i32_11 = arith.constant 0 : i32
    %25 = vector.broadcast %c0_i32_11 : i32 to vector<8x256xi32>
    %26 = arith.cmpi ne, %24, %25 : vector<8x256xi32>
    %27 = arith.extui %26 : vector<8x256xi1> to vector<8x256xi32>
    %28 = arith.sitofp %27 : vector<8x256xi32> to vector<8x256xf32>
    %c15_i32 = arith.constant 15 : i32
    %29 = vector.broadcast %c15_i32 : i32 to vector<8x256xi32>
    %30 = arith.cmpi ne, %24, %29 : vector<8x256xi32>
    %31 = arith.extui %30 : vector<8x256xi1> to vector<8x256xi32>
    %32 = arith.sitofp %31 : vector<8x256xi32> to vector<8x256xf32>
    %cst_12 = arith.constant 0.000000e+00 : f32
    %33 = vector.broadcast %cst_12 : f32 to vector<8x256xf32>
    %cst_13 = arith.constant 0.000000e+00 : f32
    %34 = vector.broadcast %cst_13 : f32 to vector<8x256xf32>
    %cst_14 = arith.constant 0.000000e+00 : f32
    %35 = vector.broadcast %cst_14 : f32 to vector<8x256xf32>
    %cst_15 = arith.constant 0.000000e+00 : f32
    %36 = vector.broadcast %cst_15 : f32 to vector<8x256xf32>
    %cst_16 = arith.constant 0.000000e+00 : f32
    %37 = vector.broadcast %cst_16 : f32 to vector<8x256xf32>
    %cst_17 = arith.constant 0.000000e+00 : f32
    %38 = vector.broadcast %cst_17 : f32 to vector<8x256xf32>
    %c0_18 = arith.constant 0 : index
    %c111 = arith.constant 111 : index
    %39 = vector.load %arg5[%c0_18, %c111] : memref<8x512xf32, #tpu.memory_space<vmem>>, vector<8x256xf32>
    %40 = arith.mulf %39, %28 : vector<8x256xf32>
    %41 = vector.extract_strided_slice %4 {offsets = [0, 0], sizes = [8, 1], strides = [1, 1]} : vector<8x36xf32> to vector<8x1xf32>
    %42 = vector.extract_strided_slice %40 {offsets = [0, 0], sizes = [1, 256], strides = [1, 1]} : vector<8x256xf32> to vector<1x256xf32>
    %43 = vector.broadcast %41 : vector<8x1xf32> to vector<8x256xf32>
    %44 = vector.broadcast %42 : vector<1x256xf32> to vector<8x256xf32>
    %45 = arith.mulf %43, %44 : vector<8x256xf32>
    %46 = arith.addf %33, %45 : vector<8x256xf32>
    %47 = vector.extract_strided_slice %4 {offsets = [0, 9], sizes = [8, 1], strides = [1, 1]} : vector<8x36xf32> to vector<8x1xf32>
    %48 = vector.extract_strided_slice %40 {offsets = [1, 0], sizes = [1, 256], strides = [1, 1]} : vector<8x256xf32> to vector<1x256xf32>
    %49 = vector.broadcast %47 : vector<8x1xf32> to vector<8x256xf32>
    %50 = vector.broadcast %48 : vector<1x256xf32> to vector<8x256xf32>
    %51 = arith.mulf %49, %50 : vector<8x256xf32>
    %52 = arith.addf %46, %51 : vector<8x256xf32>
    %53 = vector.extract_strided_slice %4 {offsets = [0, 18], sizes = [8, 1], strides = [1, 1]} : vector<8x36xf32> to vector<8x1xf32>
    %54 = vector.extract_strided_slice %40 {offsets = [2, 0], sizes = [1, 256], strides = [1, 1]} : vector<8x256xf32> to vector<1x256xf32>
    %55 = vector.broadcast %53 : vector<8x1xf32> to vector<8x256xf32>
    %56 = vector.broadcast %54 : vector<1x256xf32> to vector<8x256xf32>
    %57 = arith.mulf %55, %56 : vector<8x256xf32>
    %58 = arith.addf %52, %57 : vector<8x256xf32>
    %59 = vector.extract_strided_slice %4 {offsets = [0, 27], sizes = [8, 1], strides = [1, 1]} : vector<8x36xf32> to vector<8x1xf32>
    %60 = vector.extract_strided_slice %40 {offsets = [3, 0], sizes = [1, 256], strides = [1, 1]} : vector<8x256xf32> to vector<1x256xf32>
    %61 = vector.broadcast %59 : vector<8x1xf32> to vector<8x256xf32>
    %62 = vector.broadcast %60 : vector<1x256xf32> to vector<8x256xf32>
    %63 = arith.mulf %61, %62 : vector<8x256xf32>
    %64 = arith.addf %58, %63 : vector<8x256xf32>
    %65 = vector.extract_strided_slice %4 {offsets = [0, 0], sizes = [8, 1], strides = [1, 1]} : vector<8x36xf32> to vector<8x1xf32>
    %66 = vector.extract_strided_slice %40 {offsets = [4, 0], sizes = [1, 256], strides = [1, 1]} : vector<8x256xf32> to vector<1x256xf32>
    %67 = vector.broadcast %65 : vector<8x1xf32> to vector<8x256xf32>
    %68 = vector.broadcast %66 : vector<1x256xf32> to vector<8x256xf32>
    %69 = arith.mulf %67, %68 : vector<8x256xf32>
    %70 = arith.addf %36, %69 : vector<8x256xf32>
    %71 = vector.extract_strided_slice %4 {offsets = [0, 9], sizes = [8, 1], strides = [1, 1]} : vector<8x36xf32> to vector<8x1xf32>
    %72 = vector.extract_strided_slice %40 {offsets = [5, 0], sizes = [1, 256], strides = [1, 1]} : vector<8x256xf32> to vector<1x256xf32>
    %73 = vector.broadcast %71 : vector<8x1xf32> to vector<8x256xf32>
    %74 = vector.broadcast %72 : vector<1x256xf32> to vector<8x256xf32>
    %75 = arith.mulf %73, %74 : vector<8x256xf32>
    %76 = arith.addf %70, %75 : vector<8x256xf32>
    %77 = vector.extract_strided_slice %4 {offsets = [0, 18], sizes = [8, 1], strides = [1, 1]} : vector<8x36xf32> to vector<8x1xf32>
    %78 = vector.extract_strided_slice %40 {offsets = [6, 0], sizes = [1, 256], strides = [1, 1]} : vector<8x256xf32> to vector<1x256xf32>
    %79 = vector.broadcast %77 : vector<8x1xf32> to vector<8x256xf32>
    %80 = vector.broadcast %78 : vector<1x256xf32> to vector<8x256xf32>
    %81 = arith.mulf %79, %80 : vector<8x256xf32>
    %82 = arith.addf %76, %81 : vector<8x256xf32>
    %83 = vector.extract_strided_slice %4 {offsets = [0, 27], sizes = [8, 1], strides = [1, 1]} : vector<8x36xf32> to vector<8x1xf32>
    %84 = vector.extract_strided_slice %40 {offsets = [7, 0], sizes = [1, 256], strides = [1, 1]} : vector<8x256xf32> to vector<1x256xf32>
    %85 = vector.broadcast %83 : vector<8x1xf32> to vector<8x256xf32>
    %86 = vector.broadcast %84 : vector<1x256xf32> to vector<8x256xf32>
    %87 = arith.mulf %85, %86 : vector<8x256xf32>
    %88 = arith.addf %82, %87 : vector<8x256xf32>
    %c0_19 = arith.constant 0 : index
    %c112 = arith.constant 112 : index
    %89 = vector.load %arg5[%c0_19, %c112] : memref<8x512xf32, #tpu.memory_space<vmem>>, vector<8x256xf32>
    %90 = vector.extract_strided_slice %4 {offsets = [0, 1], sizes = [8, 1], strides = [1, 1]} : vector<8x36xf32> to vector<8x1xf32>
    %91 = vector.extract_strided_slice %89 {offsets = [0, 0], sizes = [1, 256], strides = [1, 1]} : vector<8x256xf32> to vector<1x256xf32>
    %92 = vector.broadcast %90 : vector<8x1xf32> to vector<8x256xf32>
    %93 = vector.broadcast %91 : vector<1x256xf32> to vector<8x256xf32>
    %94 = arith.mulf %92, %93 : vector<8x256xf32>
    %95 = arith.addf %64, %94 : vector<8x256xf32>
    %96 = vector.extract_strided_slice %4 {offsets = [0, 10], sizes = [8, 1], strides = [1, 1]} : vector<8x36xf32> to vector<8x1xf32>
    %97 = vector.extract_strided_slice %89 {offsets = [1, 0], sizes = [1, 256], strides = [1, 1]} : vector<8x256xf32> to vector<1x256xf32>
    %98 = vector.broadcast %96 : vector<8x1xf32> to vector<8x256xf32>
    %99 = vector.broadcast %97 : vector<1x256xf32> to vector<8x256xf32>
    %100 = arith.mulf %98, %99 : vector<8x256xf32>
    %101 = arith.addf %95, %100 : vector<8x256xf32>
    %102 = vector.extract_strided_slice %4 {offsets = [0, 19], sizes = [8, 1], strides = [1, 1]} : vector<8x36xf32> to vector<8x1xf32>
    %103 = vector.extract_strided_slice %89 {offsets = [2, 0], sizes = [1, 256], strides = [1, 1]} : vector<8x256xf32> to vector<1x256xf32>
    %104 = vector.broadcast %102 : vector<8x1xf32> to vector<8x256xf32>
    %105 = vector.broadcast %103 : vector<1x256xf32> to vector<8x256xf32>
    %106 = arith.mulf %104, %105 : vector<8x256xf32>
    %107 = arith.addf %101, %106 : vector<8x256xf32>
    %108 = vector.extract_strided_slice %4 {offsets = [0, 28], sizes = [8, 1], strides = [1, 1]} : vector<8x36xf32> to vector<8x1xf32>
    %109 = vector.extract_strided_slice %89 {offsets = [3, 0], sizes = [1, 256], strides = [1, 1]} : vector<8x256xf32> to vector<1x256xf32>
    %110 = vector.broadcast %108 : vector<8x1xf32> to vector<8x256xf32>
    %111 = vector.broadcast %109 : vector<1x256xf32> to vector<8x256xf32>
    %112 = arith.mulf %110, %111 : vector<8x256xf32>
    %113 = arith.addf %107, %112 : vector<8x256xf32>
    %114 = vector.extract_strided_slice %4 {offsets = [0, 1], sizes = [8, 1], strides = [1, 1]} : vector<8x36xf32> to vector<8x1xf32>
    %115 = vector.extract_strided_slice %89 {offsets = [4, 0], sizes = [1, 256], strides = [1, 1]} : vector<8x256xf32> to vector<1x256xf32>
    %116 = vector.broadcast %114 : vector<8x1xf32> to vector<8x256xf32>
    %117 = vector.broadcast %115 : vector<1x256xf32> to vector<8x256xf32>
    %118 = arith.mulf %116, %117 : vector<8x256xf32>
    %119 = arith.addf %88, %118 : vector<8x256xf32>
    %120 = vector.extract_strided_slice %4 {offsets = [0, 10], sizes = [8, 1], strides = [1, 1]} : vector<8x36xf32> to vector<8x1xf32>
    %121 = vector.extract_strided_slice %89 {offsets = [5, 0], sizes = [1, 256], strides = [1, 1]} : vector<8x256xf32> to vector<1x256xf32>
    %122 = vector.broadcast %120 : vector<8x1xf32> to vector<8x256xf32>
    %123 = vector.broadcast %121 : vector<1x256xf32> to vector<8x256xf32>
    %124 = arith.mulf %122, %123 : vector<8x256xf32>
    %125 = arith.addf %119, %124 : vector<8x256xf32>
    %126 = vector.extract_strided_slice %4 {offsets = [0, 19], sizes = [8, 1], strides = [1, 1]} : vector<8x36xf32> to vector<8x1xf32>
    %127 = vector.extract_strided_slice %89 {offsets = [6, 0], sizes = [1, 256], strides = [1, 1]} : vector<8x256xf32> to vector<1x256xf32>
    %128 = vector.broadcast %126 : vector<8x1xf32> to vector<8x256xf32>
    %129 = vector.broadcast %127 : vector<1x256xf32> to vector<8x256xf32>
    %130 = arith.mulf %128, %129 : vector<8x256xf32>
    %131 = arith.addf %125, %130 : vector<8x256xf32>
    %132 = vector.extract_strided_slice %4 {offsets = [0, 28], sizes = [8, 1], strides = [1, 1]} : vector<8x36xf32> to vector<8x1xf32>
    %133 = vector.extract_strided_slice %89 {offsets = [7, 0], sizes = [1, 256], strides = [1, 1]} : vector<8x256xf32> to vector<1x256xf32>
    %134 = vector.broadcast %132 : vector<8x1xf32> to vector<8x256xf32>
    %135 = vector.broadcast %133 : vector<1x256xf32> to vector<8x256xf32>
    %136 = arith.mulf %134, %135 : vector<8x256xf32>
    %137 = arith.addf %131, %136 : vector<8x256xf32>
    %c0_20 = arith.constant 0 : index
    %c113 = arith.constant 113 : index
    %138 = vector.load %arg5[%c0_20, %c113] : memref<8x512xf32, #tpu.memory_space<vmem>>, vector<8x256xf32>
    %139 = arith.mulf %138, %32 : vector<8x256xf32>
    %140 = vector.extract_strided_slice %4 {offsets = [0, 2], sizes = [8, 1], strides = [1, 1]} : vector<8x36xf32> to vector<8x1xf32>
    %141 = vector.extract_strided_slice %139 {offsets = [0, 0], sizes = [1, 256], strides = [1, 1]} : vector<8x256xf32> to vector<1x256xf32>
    %142 = vector.broadcast %140 : vector<8x1xf32> to vector<8x256xf32>
    %143 = vector.broadcast %141 : vector<1x256xf32> to vector<8x256xf32>
    %144 = arith.mulf %142, %143 : vector<8x256xf32>
    %145 = arith.addf %113, %144 : vector<8x256xf32>
    %146 = vector.extract_strided_slice %4 {offsets = [0, 11], sizes = [8, 1], strides = [1, 1]} : vector<8x36xf32> to vector<8x1xf32>
    %147 = vector.extract_strided_slice %139 {offsets = [1, 0], sizes = [1, 256], strides = [1, 1]} : vector<8x256xf32> to vector<1x256xf32>
    %148 = vector.broadcast %146 : vector<8x1xf32> to vector<8x256xf32>
    %149 = vector.broadcast %147 : vector<1x256xf32> to vector<8x256xf32>
    %150 = arith.mulf %148, %149 : vector<8x256xf32>
    %151 = arith.addf %145, %150 : vector<8x256xf32>
    %152 = vector.extract_strided_slice %4 {offsets = [0, 20], sizes = [8, 1], strides = [1, 1]} : vector<8x36xf32> to vector<8x1xf32>
    %153 = vector.extract_strided_slice %139 {offsets = [2, 0], sizes = [1, 256], strides = [1, 1]} : vector<8x256xf32> to vector<1x256xf32>
    %154 = vector.broadcast %152 : vector<8x1xf32> to vector<8x256xf32>
    %155 = vector.broadcast %153 : vector<1x256xf32> to vector<8x256xf32>
    %156 = arith.mulf %154, %155 : vector<8x256xf32>
    %157 = arith.addf %151, %156 : vector<8x256xf32>
    %158 = vector.extract_strided_slice %4 {offsets = [0, 29], sizes = [8, 1], strides = [1, 1]} : vector<8x36xf32> to vector<8x1xf32>
    %159 = vector.extract_strided_slice %139 {offsets = [3, 0], sizes = [1, 256], strides = [1, 1]} : vector<8x256xf32> to vector<1x256xf32>
    %160 = vector.broadcast %158 : vector<8x1xf32> to vector<8x256xf32>
    %161 = vector.broadcast %159 : vector<1x256xf32> to vector<8x256xf32>
    %162 = arith.mulf %160, %161 : vector<8x256xf32>
    %163 = arith.addf %157, %162 : vector<8x256xf32>
    %164 = vector.extract_strided_slice %4 {offsets = [0, 2], sizes = [8, 1], strides = [1, 1]} : vector<8x36xf32> to vector<8x1xf32>
    %165 = vector.extract_strided_slice %139 {offsets = [4, 0], sizes = [1, 256], strides = [1, 1]} : vector<8x256xf32> to vector<1x256xf32>
    %166 = vector.broadcast %164 : vector<8x1xf32> to vector<8x256xf32>
    %167 = vector.broadcast %165 : vector<1x256xf32> to vector<8x256xf32>
    %168 = arith.mulf %166, %167 : vector<8x256xf32>
    %169 = arith.addf %137, %168 : vector<8x256xf32>
    %170 = vector.extract_strided_slice %4 {offsets = [0, 11], sizes = [8, 1], strides = [1, 1]} : vector<8x36xf32> to vector<8x1xf32>
    %171 = vector.extract_strided_slice %139 {offsets = [5, 0], sizes = [1, 256], strides = [1, 1]} : vector<8x256xf32> to vector<1x256xf32>
    %172 = vector.broadcast %170 : vector<8x1xf32> to vector<8x256xf32>
    %173 = vector.broadcast %171 : vector<1x256xf32> to vector<8x256xf32>
    %174 = arith.mulf %172, %173 : vector<8x256xf32>
    %175 = arith.addf %169, %174 : vector<8x256xf32>
    %176 = vector.extract_strided_slice %4 {offsets = [0, 20], sizes = [8, 1], strides = [1, 1]} : vector<8x36xf32> to vector<8x1xf32>
    %177 = vector.extract_strided_slice %139 {offsets = [6, 0], sizes = [1, 256], strides = [1, 1]} : vector<8x256xf32> to vector<1x256xf32>
    %178 = vector.broadcast %176 : vector<8x1xf32> to vector<8x256xf32>
    %179 = vector.broadcast %177 : vector<1x256xf32> to vector<8x256xf32>
    %180 = arith.mulf %178, %179 : vector<8x256xf32>
    %181 = arith.addf %175, %180 : vector<8x256xf32>
    %182 = vector.extract_strided_slice %4 {offsets = [0, 29], sizes = [8, 1], strides = [1, 1]} : vector<8x36xf32> to vector<8x1xf32>
    %183 = vector.extract_strided_slice %139 {offsets = [7, 0], sizes = [1, 256], strides = [1, 1]} : vector<8x256xf32> to vector<1x256xf32>
    %184 = vector.broadcast %182 : vector<8x1xf32> to vector<8x256xf32>
    %185 = vector.broadcast %183 : vector<1x256xf32> to vector<8x256xf32>
    %186 = arith.mulf %184, %185 : vector<8x256xf32>
    %187 = arith.addf %181, %186 : vector<8x256xf32>
    %c0_21 = arith.constant 0 : index
    %c127 = arith.constant 127 : index
    %188 = vector.load %arg5[%c0_21, %c127] : memref<8x512xf32, #tpu.memory_space<vmem>>, vector<8x256xf32>
    %189 = arith.mulf %188, %28 : vector<8x256xf32>
    %190 = vector.extract_strided_slice %4 {offsets = [0, 3], sizes = [8, 1], strides = [1, 1]} : vector<8x36xf32> to vector<8x1xf32>
    %191 = vector.extract_strided_slice %189 {offsets = [0, 0], sizes = [1, 256], strides = [1, 1]} : vector<8x256xf32> to vector<1x256xf32>
    %192 = vector.broadcast %190 : vector<8x1xf32> to vector<8x256xf32>
    %193 = vector.broadcast %191 : vector<1x256xf32> to vector<8x256xf32>
    %194 = arith.mulf %192, %193 : vector<8x256xf32>
    %195 = arith.addf %34, %194 : vector<8x256xf32>
    %196 = vector.extract_strided_slice %4 {offsets = [0, 12], sizes = [8, 1], strides = [1, 1]} : vector<8x36xf32> to vector<8x1xf32>
    %197 = vector.extract_strided_slice %189 {offsets = [1, 0], sizes = [1, 256], strides = [1, 1]} : vector<8x256xf32> to vector<1x256xf32>
    %198 = vector.broadcast %196 : vector<8x1xf32> to vector<8x256xf32>
    %199 = vector.broadcast %197 : vector<1x256xf32> to vector<8x256xf32>
    %200 = arith.mulf %198, %199 : vector<8x256xf32>
    %201 = arith.addf %195, %200 : vector<8x256xf32>
    %202 = vector.extract_strided_slice %4 {offsets = [0, 21], sizes = [8, 1], strides = [1, 1]} : vector<8x36xf32> to vector<8x1xf32>
    %203 = vector.extract_strided_slice %189 {offsets = [2, 0], sizes = [1, 256], strides = [1, 1]} : vector<8x256xf32> to vector<1x256xf32>
    %204 = vector.broadcast %202 : vector<8x1xf32> to vector<8x256xf32>
    %205 = vector.broadcast %203 : vector<1x256xf32> to vector<8x256xf32>
    %206 = arith.mulf %204, %205 : vector<8x256xf32>
    %207 = arith.addf %201, %206 : vector<8x256xf32>
    %208 = vector.extract_strided_slice %4 {offsets = [0, 30], sizes = [8, 1], strides = [1, 1]} : vector<8x36xf32> to vector<8x1xf32>
    %209 = vector.extract_strided_slice %189 {offsets = [3, 0], sizes = [1, 256], strides = [1, 1]} : vector<8x256xf32> to vector<1x256xf32>
    %210 = vector.broadcast %208 : vector<8x1xf32> to vector<8x256xf32>
    %211 = vector.broadcast %209 : vector<1x256xf32> to vector<8x256xf32>
    %212 = arith.mulf %210, %211 : vector<8x256xf32>
    %213 = arith.addf %207, %212 : vector<8x256xf32>
    %214 = vector.extract_strided_slice %4 {offsets = [0, 3], sizes = [8, 1], strides = [1, 1]} : vector<8x36xf32> to vector<8x1xf32>
    %215 = vector.extract_strided_slice %189 {offsets = [4, 0], sizes = [1, 256], strides = [1, 1]} : vector<8x256xf32> to vector<1x256xf32>
    %216 = vector.broadcast %214 : vector<8x1xf32> to vector<8x256xf32>
    %217 = vector.broadcast %215 : vector<1x256xf32> to vector<8x256xf32>
    %218 = arith.mulf %216, %217 : vector<8x256xf32>
    %219 = arith.addf %37, %218 : vector<8x256xf32>
    %220 = vector.extract_strided_slice %4 {offsets = [0, 12], sizes = [8, 1], strides = [1, 1]} : vector<8x36xf32> to vector<8x1xf32>
    %221 = vector.extract_strided_slice %189 {offsets = [5, 0], sizes = [1, 256], strides = [1, 1]} : vector<8x256xf32> to vector<1x256xf32>
    %222 = vector.broadcast %220 : vector<8x1xf32> to vector<8x256xf32>
    %223 = vector.broadcast %221 : vector<1x256xf32> to vector<8x256xf32>
    %224 = arith.mulf %222, %223 : vector<8x256xf32>
    %225 = arith.addf %219, %224 : vector<8x256xf32>
    %226 = vector.extract_strided_slice %4 {offsets = [0, 21], sizes = [8, 1], strides = [1, 1]} : vector<8x36xf32> to vector<8x1xf32>
    %227 = vector.extract_strided_slice %189 {offsets = [6, 0], sizes = [1, 256], strides = [1, 1]} : vector<8x256xf32> to vector<1x256xf32>
    %228 = vector.broadcast %226 : vector<8x1xf32> to vector<8x256xf32>
    %229 = vector.broadcast %227 : vector<1x256xf32> to vector<8x256xf32>
    %230 = arith.mulf %228, %229 : vector<8x256xf32>
    %231 = arith.addf %225, %230 : vector<8x256xf32>
    %232 = vector.extract_strided_slice %4 {offsets = [0, 30], sizes = [8, 1], strides = [1, 1]} : vector<8x36xf32> to vector<8x1xf32>
    %233 = vector.extract_strided_slice %189 {offsets = [7, 0], sizes = [1, 256], strides = [1, 1]} : vector<8x256xf32> to vector<1x256xf32>
    %234 = vector.broadcast %232 : vector<8x1xf32> to vector<8x256xf32>
    %235 = vector.broadcast %233 : vector<1x256xf32> to vector<8x256xf32>
    %236 = arith.mulf %234, %235 : vector<8x256xf32>
    %237 = arith.addf %231, %236 : vector<8x256xf32>
    %c0_22 = arith.constant 0 : index
    %c128_23 = arith.constant 128 : index
    %238 = vector.load %arg5[%c0_22, %c128_23] : memref<8x512xf32, #tpu.memory_space<vmem>>, vector<8x256xf32>
    %239 = vector.extract_strided_slice %4 {offsets = [0, 4], sizes = [8, 1], strides = [1, 1]} : vector<8x36xf32> to vector<8x1xf32>
    %240 = vector.extract_strided_slice %238 {offsets = [0, 0], sizes = [1, 256], strides = [1, 1]} : vector<8x256xf32> to vector<1x256xf32>
    %241 = vector.broadcast %239 : vector<8x1xf32> to vector<8x256xf32>
    %242 = vector.broadcast %240 : vector<1x256xf32> to vector<8x256xf32>
    %243 = arith.mulf %241, %242 : vector<8x256xf32>
    %244 = arith.addf %213, %243 : vector<8x256xf32>
    %245 = vector.extract_strided_slice %4 {offsets = [0, 13], sizes = [8, 1], strides = [1, 1]} : vector<8x36xf32> to vector<8x1xf32>
    %246 = vector.extract_strided_slice %238 {offsets = [1, 0], sizes = [1, 256], strides = [1, 1]} : vector<8x256xf32> to vector<1x256xf32>
    %247 = vector.broadcast %245 : vector<8x1xf32> to vector<8x256xf32>
    %248 = vector.broadcast %246 : vector<1x256xf32> to vector<8x256xf32>
    %249 = arith.mulf %247, %248 : vector<8x256xf32>
    %250 = arith.addf %244, %249 : vector<8x256xf32>
    %251 = vector.extract_strided_slice %4 {offsets = [0, 22], sizes = [8, 1], strides = [1, 1]} : vector<8x36xf32> to vector<8x1xf32>
    %252 = vector.extract_strided_slice %238 {offsets = [2, 0], sizes = [1, 256], strides = [1, 1]} : vector<8x256xf32> to vector<1x256xf32>
    %253 = vector.broadcast %251 : vector<8x1xf32> to vector<8x256xf32>
    %254 = vector.broadcast %252 : vector<1x256xf32> to vector<8x256xf32>
    %255 = arith.mulf %253, %254 : vector<8x256xf32>
    %256 = arith.addf %250, %255 : vector<8x256xf32>
    %257 = vector.extract_strided_slice %4 {offsets = [0, 31], sizes = [8, 1], strides = [1, 1]} : vector<8x36xf32> to vector<8x1xf32>
    %258 = vector.extract_strided_slice %238 {offsets = [3, 0], sizes = [1, 256], strides = [1, 1]} : vector<8x256xf32> to vector<1x256xf32>
    %259 = vector.broadcast %257 : vector<8x1xf32> to vector<8x256xf32>
    %260 = vector.broadcast %258 : vector<1x256xf32> to vector<8x256xf32>
    %261 = arith.mulf %259, %260 : vector<8x256xf32>
    %262 = arith.addf %256, %261 : vector<8x256xf32>
    %263 = vector.extract_strided_slice %4 {offsets = [0, 4], sizes = [8, 1], strides = [1, 1]} : vector<8x36xf32> to vector<8x1xf32>
    %264 = vector.extract_strided_slice %238 {offsets = [4, 0], sizes = [1, 256], strides = [1, 1]} : vector<8x256xf32> to vector<1x256xf32>
    %265 = vector.broadcast %263 : vector<8x1xf32> to vector<8x256xf32>
    %266 = vector.broadcast %264 : vector<1x256xf32> to vector<8x256xf32>
    %267 = arith.mulf %265, %266 : vector<8x256xf32>
    %268 = arith.addf %237, %267 : vector<8x256xf32>
    %269 = vector.extract_strided_slice %4 {offsets = [0, 13], sizes = [8, 1], strides = [1, 1]} : vector<8x36xf32> to vector<8x1xf32>
    %270 = vector.extract_strided_slice %238 {offsets = [5, 0], sizes = [1, 256], strides = [1, 1]} : vector<8x256xf32> to vector<1x256xf32>
    %271 = vector.broadcast %269 : vector<8x1xf32> to vector<8x256xf32>
    %272 = vector.broadcast %270 : vector<1x256xf32> to vector<8x256xf32>
    %273 = arith.mulf %271, %272 : vector<8x256xf32>
    %274 = arith.addf %268, %273 : vector<8x256xf32>
    %275 = vector.extract_strided_slice %4 {offsets = [0, 22], sizes = [8, 1], strides = [1, 1]} : vector<8x36xf32> to vector<8x1xf32>
    %276 = vector.extract_strided_slice %238 {offsets = [6, 0], sizes = [1, 256], strides = [1, 1]} : vector<8x256xf32> to vector<1x256xf32>
    %277 = vector.broadcast %275 : vector<8x1xf32> to vector<8x256xf32>
    %278 = vector.broadcast %276 : vector<1x256xf32> to vector<8x256xf32>
    %279 = arith.mulf %277, %278 : vector<8x256xf32>
    %280 = arith.addf %274, %279 : vector<8x256xf32>
    %281 = vector.extract_strided_slice %4 {offsets = [0, 31], sizes = [8, 1], strides = [1, 1]} : vector<8x36xf32> to vector<8x1xf32>
    %282 = vector.extract_strided_slice %238 {offsets = [7, 0], sizes = [1, 256], strides = [1, 1]} : vector<8x256xf32> to vector<1x256xf32>
    %283 = vector.broadcast %281 : vector<8x1xf32> to vector<8x256xf32>
    %284 = vector.broadcast %282 : vector<1x256xf32> to vector<8x256xf32>
    %285 = arith.mulf %283, %284 : vector<8x256xf32>
    %286 = arith.addf %280, %285 : vector<8x256xf32>
    %c0_24 = arith.constant 0 : index
    %c129 = arith.constant 129 : index
    %287 = vector.load %arg5[%c0_24, %c129] : memref<8x512xf32, #tpu.memory_space<vmem>>, vector<8x256xf32>
    %288 = arith.mulf %287, %32 : vector<8x256xf32>
    %289 = vector.extract_strided_slice %4 {offsets = [0, 5], sizes = [8, 1], strides = [1, 1]} : vector<8x36xf32> to vector<8x1xf32>
    %290 = vector.extract_strided_slice %288 {offsets = [0, 0], sizes = [1, 256], strides = [1, 1]} : vector<8x256xf32> to vector<1x256xf32>
    %291 = vector.broadcast %289 : vector<8x1xf32> to vector<8x256xf32>
    %292 = vector.broadcast %290 : vector<1x256xf32> to vector<8x256xf32>
    %293 = arith.mulf %291, %292 : vector<8x256xf32>
    %294 = arith.addf %262, %293 : vector<8x256xf32>
    %295 = vector.extract_strided_slice %4 {offsets = [0, 14], sizes = [8, 1], strides = [1, 1]} : vector<8x36xf32> to vector<8x1xf32>
    %296 = vector.extract_strided_slice %288 {offsets = [1, 0], sizes = [1, 256], strides = [1, 1]} : vector<8x256xf32> to vector<1x256xf32>
    %297 = vector.broadcast %295 : vector<8x1xf32> to vector<8x256xf32>
    %298 = vector.broadcast %296 : vector<1x256xf32> to vector<8x256xf32>
    %299 = arith.mulf %297, %298 : vector<8x256xf32>
    %300 = arith.addf %294, %299 : vector<8x256xf32>
    %301 = vector.extract_strided_slice %4 {offsets = [0, 23], sizes = [8, 1], strides = [1, 1]} : vector<8x36xf32> to vector<8x1xf32>
    %302 = vector.extract_strided_slice %288 {offsets = [2, 0], sizes = [1, 256], strides = [1, 1]} : vector<8x256xf32> to vector<1x256xf32>
    %303 = vector.broadcast %301 : vector<8x1xf32> to vector<8x256xf32>
    %304 = vector.broadcast %302 : vector<1x256xf32> to vector<8x256xf32>
    %305 = arith.mulf %303, %304 : vector<8x256xf32>
    %306 = arith.addf %300, %305 : vector<8x256xf32>
    %307 = vector.extract_strided_slice %4 {offsets = [0, 32], sizes = [8, 1], strides = [1, 1]} : vector<8x36xf32> to vector<8x1xf32>
    %308 = vector.extract_strided_slice %288 {offsets = [3, 0], sizes = [1, 256], strides = [1, 1]} : vector<8x256xf32> to vector<1x256xf32>
    %309 = vector.broadcast %307 : vector<8x1xf32> to vector<8x256xf32>
    %310 = vector.broadcast %308 : vector<1x256xf32> to vector<8x256xf32>
    %311 = arith.mulf %309, %310 : vector<8x256xf32>
    %312 = arith.addf %306, %311 : vector<8x256xf32>
    %313 = vector.extract_strided_slice %4 {offsets = [0, 5], sizes = [8, 1], strides = [1, 1]} : vector<8x36xf32> to vector<8x1xf32>
    %314 = vector.extract_strided_slice %288 {offsets = [4, 0], sizes = [1, 256], strides = [1, 1]} : vector<8x256xf32> to vector<1x256xf32>
    %315 = vector.broadcast %313 : vector<8x1xf32> to vector<8x256xf32>
    %316 = vector.broadcast %314 : vector<1x256xf32> to vector<8x256xf32>
    %317 = arith.mulf %315, %316 : vector<8x256xf32>
    %318 = arith.addf %286, %317 : vector<8x256xf32>
    %319 = vector.extract_strided_slice %4 {offsets = [0, 14], sizes = [8, 1], strides = [1, 1]} : vector<8x36xf32> to vector<8x1xf32>
    %320 = vector.extract_strided_slice %288 {offsets = [5, 0], sizes = [1, 256], strides = [1, 1]} : vector<8x256xf32> to vector<1x256xf32>
    %321 = vector.broadcast %319 : vector<8x1xf32> to vector<8x256xf32>
    %322 = vector.broadcast %320 : vector<1x256xf32> to vector<8x256xf32>
    %323 = arith.mulf %321, %322 : vector<8x256xf32>
    %324 = arith.addf %318, %323 : vector<8x256xf32>
    %325 = vector.extract_strided_slice %4 {offsets = [0, 23], sizes = [8, 1], strides = [1, 1]} : vector<8x36xf32> to vector<8x1xf32>
    %326 = vector.extract_strided_slice %288 {offsets = [6, 0], sizes = [1, 256], strides = [1, 1]} : vector<8x256xf32> to vector<1x256xf32>
    %327 = vector.broadcast %325 : vector<8x1xf32> to vector<8x256xf32>
    %328 = vector.broadcast %326 : vector<1x256xf32> to vector<8x256xf32>
    %329 = arith.mulf %327, %328 : vector<8x256xf32>
    %330 = arith.addf %324, %329 : vector<8x256xf32>
    %331 = vector.extract_strided_slice %4 {offsets = [0, 32], sizes = [8, 1], strides = [1, 1]} : vector<8x36xf32> to vector<8x1xf32>
    %332 = vector.extract_strided_slice %288 {offsets = [7, 0], sizes = [1, 256], strides = [1, 1]} : vector<8x256xf32> to vector<1x256xf32>
    %333 = vector.broadcast %331 : vector<8x1xf32> to vector<8x256xf32>
    %334 = vector.broadcast %332 : vector<1x256xf32> to vector<8x256xf32>
    %335 = arith.mulf %333, %334 : vector<8x256xf32>
    %336 = arith.addf %330, %335 : vector<8x256xf32>
    %c0_25 = arith.constant 0 : index
    %c143 = arith.constant 143 : index
    %337 = vector.load %arg5[%c0_25, %c143] : memref<8x512xf32, #tpu.memory_space<vmem>>, vector<8x256xf32>
    %338 = arith.mulf %337, %28 : vector<8x256xf32>
    %339 = vector.extract_strided_slice %4 {offsets = [0, 6], sizes = [8, 1], strides = [1, 1]} : vector<8x36xf32> to vector<8x1xf32>
    %340 = vector.extract_strided_slice %338 {offsets = [0, 0], sizes = [1, 256], strides = [1, 1]} : vector<8x256xf32> to vector<1x256xf32>
    %341 = vector.broadcast %339 : vector<8x1xf32> to vector<8x256xf32>
    %342 = vector.broadcast %340 : vector<1x256xf32> to vector<8x256xf32>
    %343 = arith.mulf %341, %342 : vector<8x256xf32>
    %344 = arith.addf %35, %343 : vector<8x256xf32>
    %345 = vector.extract_strided_slice %4 {offsets = [0, 15], sizes = [8, 1], strides = [1, 1]} : vector<8x36xf32> to vector<8x1xf32>
    %346 = vector.extract_strided_slice %338 {offsets = [1, 0], sizes = [1, 256], strides = [1, 1]} : vector<8x256xf32> to vector<1x256xf32>
    %347 = vector.broadcast %345 : vector<8x1xf32> to vector<8x256xf32>
    %348 = vector.broadcast %346 : vector<1x256xf32> to vector<8x256xf32>
    %349 = arith.mulf %347, %348 : vector<8x256xf32>
    %350 = arith.addf %344, %349 : vector<8x256xf32>
    %351 = vector.extract_strided_slice %4 {offsets = [0, 24], sizes = [8, 1], strides = [1, 1]} : vector<8x36xf32> to vector<8x1xf32>
    %352 = vector.extract_strided_slice %338 {offsets = [2, 0], sizes = [1, 256], strides = [1, 1]} : vector<8x256xf32> to vector<1x256xf32>
    %353 = vector.broadcast %351 : vector<8x1xf32> to vector<8x256xf32>
    %354 = vector.broadcast %352 : vector<1x256xf32> to vector<8x256xf32>
    %355 = arith.mulf %353, %354 : vector<8x256xf32>
    %356 = arith.addf %350, %355 : vector<8x256xf32>
    %357 = vector.extract_strided_slice %4 {offsets = [0, 33], sizes = [8, 1], strides = [1, 1]} : vector<8x36xf32> to vector<8x1xf32>
    %358 = vector.extract_strided_slice %338 {offsets = [3, 0], sizes = [1, 256], strides = [1, 1]} : vector<8x256xf32> to vector<1x256xf32>
    %359 = vector.broadcast %357 : vector<8x1xf32> to vector<8x256xf32>
    %360 = vector.broadcast %358 : vector<1x256xf32> to vector<8x256xf32>
    %361 = arith.mulf %359, %360 : vector<8x256xf32>
    %362 = arith.addf %356, %361 : vector<8x256xf32>
    %363 = vector.extract_strided_slice %4 {offsets = [0, 6], sizes = [8, 1], strides = [1, 1]} : vector<8x36xf32> to vector<8x1xf32>
    %364 = vector.extract_strided_slice %338 {offsets = [4, 0], sizes = [1, 256], strides = [1, 1]} : vector<8x256xf32> to vector<1x256xf32>
    %365 = vector.broadcast %363 : vector<8x1xf32> to vector<8x256xf32>
    %366 = vector.broadcast %364 : vector<1x256xf32> to vector<8x256xf32>
    %367 = arith.mulf %365, %366 : vector<8x256xf32>
    %368 = arith.addf %38, %367 : vector<8x256xf32>
    %369 = vector.extract_strided_slice %4 {offsets = [0, 15], sizes = [8, 1], strides = [1, 1]} : vector<8x36xf32> to vector<8x1xf32>
    %370 = vector.extract_strided_slice %338 {offsets = [5, 0], sizes = [1, 256], strides = [1, 1]} : vector<8x256xf32> to vector<1x256xf32>
    %371 = vector.broadcast %369 : vector<8x1xf32> to vector<8x256xf32>
    %372 = vector.broadcast %370 : vector<1x256xf32> to vector<8x256xf32>
    %373 = arith.mulf %371, %372 : vector<8x256xf32>
    %374 = arith.addf %368, %373 : vector<8x256xf32>
    %375 = vector.extract_strided_slice %4 {offsets = [0, 24], sizes = [8, 1], strides = [1, 1]} : vector<8x36xf32> to vector<8x1xf32>
    %376 = vector.extract_strided_slice %338 {offsets = [6, 0], sizes = [1, 256], strides = [1, 1]} : vector<8x256xf32> to vector<1x256xf32>
    %377 = vector.broadcast %375 : vector<8x1xf32> to vector<8x256xf32>
    %378 = vector.broadcast %376 : vector<1x256xf32> to vector<8x256xf32>
    %379 = arith.mulf %377, %378 : vector<8x256xf32>
    %380 = arith.addf %374, %379 : vector<8x256xf32>
    %381 = vector.extract_strided_slice %4 {offsets = [0, 33], sizes = [8, 1], strides = [1, 1]} : vector<8x36xf32> to vector<8x1xf32>
    %382 = vector.extract_strided_slice %338 {offsets = [7, 0], sizes = [1, 256], strides = [1, 1]} : vector<8x256xf32> to vector<1x256xf32>
    %383 = vector.broadcast %381 : vector<8x1xf32> to vector<8x256xf32>
    %384 = vector.broadcast %382 : vector<1x256xf32> to vector<8x256xf32>
    %385 = arith.mulf %383, %384 : vector<8x256xf32>
    %386 = arith.addf %380, %385 : vector<8x256xf32>
    %c0_26 = arith.constant 0 : index
    %c144 = arith.constant 144 : index
    %387 = vector.load %arg5[%c0_26, %c144] : memref<8x512xf32, #tpu.memory_space<vmem>>, vector<8x256xf32>
    %388 = vector.extract_strided_slice %4 {offsets = [0, 7], sizes = [8, 1], strides = [1, 1]} : vector<8x36xf32> to vector<8x1xf32>
    %389 = vector.extract_strided_slice %387 {offsets = [0, 0], sizes = [1, 256], strides = [1, 1]} : vector<8x256xf32> to vector<1x256xf32>
    %390 = vector.broadcast %388 : vector<8x1xf32> to vector<8x256xf32>
    %391 = vector.broadcast %389 : vector<1x256xf32> to vector<8x256xf32>
    %392 = arith.mulf %390, %391 : vector<8x256xf32>
    %393 = arith.addf %362, %392 : vector<8x256xf32>
    %394 = vector.extract_strided_slice %4 {offsets = [0, 16], sizes = [8, 1], strides = [1, 1]} : vector<8x36xf32> to vector<8x1xf32>
    %395 = vector.extract_strided_slice %387 {offsets = [1, 0], sizes = [1, 256], strides = [1, 1]} : vector<8x256xf32> to vector<1x256xf32>
    %396 = vector.broadcast %394 : vector<8x1xf32> to vector<8x256xf32>
    %397 = vector.broadcast %395 : vector<1x256xf32> to vector<8x256xf32>
    %398 = arith.mulf %396, %397 : vector<8x256xf32>
    %399 = arith.addf %393, %398 : vector<8x256xf32>
    %400 = vector.extract_strided_slice %4 {offsets = [0, 25], sizes = [8, 1], strides = [1, 1]} : vector<8x36xf32> to vector<8x1xf32>
    %401 = vector.extract_strided_slice %387 {offsets = [2, 0], sizes = [1, 256], strides = [1, 1]} : vector<8x256xf32> to vector<1x256xf32>
    %402 = vector.broadcast %400 : vector<8x1xf32> to vector<8x256xf32>
    %403 = vector.broadcast %401 : vector<1x256xf32> to vector<8x256xf32>
    %404 = arith.mulf %402, %403 : vector<8x256xf32>
    %405 = arith.addf %399, %404 : vector<8x256xf32>
    %406 = vector.extract_strided_slice %4 {offsets = [0, 34], sizes = [8, 1], strides = [1, 1]} : vector<8x36xf32> to vector<8x1xf32>
    %407 = vector.extract_strided_slice %387 {offsets = [3, 0], sizes = [1, 256], strides = [1, 1]} : vector<8x256xf32> to vector<1x256xf32>
    %408 = vector.broadcast %406 : vector<8x1xf32> to vector<8x256xf32>
    %409 = vector.broadcast %407 : vector<1x256xf32> to vector<8x256xf32>
    %410 = arith.mulf %408, %409 : vector<8x256xf32>
    %411 = arith.addf %405, %410 : vector<8x256xf32>
    %412 = vector.extract_strided_slice %4 {offsets = [0, 7], sizes = [8, 1], strides = [1, 1]} : vector<8x36xf32> to vector<8x1xf32>
    %413 = vector.extract_strided_slice %387 {offsets = [4, 0], sizes = [1, 256], strides = [1, 1]} : vector<8x256xf32> to vector<1x256xf32>
    %414 = vector.broadcast %412 : vector<8x1xf32> to vector<8x256xf32>
    %415 = vector.broadcast %413 : vector<1x256xf32> to vector<8x256xf32>
    %416 = arith.mulf %414, %415 : vector<8x256xf32>
    %417 = arith.addf %386, %416 : vector<8x256xf32>
    %418 = vector.extract_strided_slice %4 {offsets = [0, 16], sizes = [8, 1], strides = [1, 1]} : vector<8x36xf32> to vector<8x1xf32>
    %419 = vector.extract_strided_slice %387 {offsets = [5, 0], sizes = [1, 256], strides = [1, 1]} : vector<8x256xf32> to vector<1x256xf32>
    %420 = vector.broadcast %418 : vector<8x1xf32> to vector<8x256xf32>
    %421 = vector.broadcast %419 : vector<1x256xf32> to vector<8x256xf32>
    %422 = arith.mulf %420, %421 : vector<8x256xf32>
    %423 = arith.addf %417, %422 : vector<8x256xf32>
    %424 = vector.extract_strided_slice %4 {offsets = [0, 25], sizes = [8, 1], strides = [1, 1]} : vector<8x36xf32> to vector<8x1xf32>
    %425 = vector.extract_strided_slice %387 {offsets = [6, 0], sizes = [1, 256], strides = [1, 1]} : vector<8x256xf32> to vector<1x256xf32>
    %426 = vector.broadcast %424 : vector<8x1xf32> to vector<8x256xf32>
    %427 = vector.broadcast %425 : vector<1x256xf32> to vector<8x256xf32>
    %428 = arith.mulf %426, %427 : vector<8x256xf32>
    %429 = arith.addf %423, %428 : vector<8x256xf32>
    %430 = vector.extract_strided_slice %4 {offsets = [0, 34], sizes = [8, 1], strides = [1, 1]} : vector<8x36xf32> to vector<8x1xf32>
    %431 = vector.extract_strided_slice %387 {offsets = [7, 0], sizes = [1, 256], strides = [1, 1]} : vector<8x256xf32> to vector<1x256xf32>
    %432 = vector.broadcast %430 : vector<8x1xf32> to vector<8x256xf32>
    %433 = vector.broadcast %431 : vector<1x256xf32> to vector<8x256xf32>
    %434 = arith.mulf %432, %433 : vector<8x256xf32>
    %435 = arith.addf %429, %434 : vector<8x256xf32>
    %c0_27 = arith.constant 0 : index
    %c145 = arith.constant 145 : index
    %436 = vector.load %arg5[%c0_27, %c145] : memref<8x512xf32, #tpu.memory_space<vmem>>, vector<8x256xf32>
    %437 = arith.mulf %436, %32 : vector<8x256xf32>
    %438 = vector.extract_strided_slice %4 {offsets = [0, 8], sizes = [8, 1], strides = [1, 1]} : vector<8x36xf32> to vector<8x1xf32>
    %439 = vector.extract_strided_slice %437 {offsets = [0, 0], sizes = [1, 256], strides = [1, 1]} : vector<8x256xf32> to vector<1x256xf32>
    %440 = vector.broadcast %438 : vector<8x1xf32> to vector<8x256xf32>
    %441 = vector.broadcast %439 : vector<1x256xf32> to vector<8x256xf32>
    %442 = arith.mulf %440, %441 : vector<8x256xf32>
    %443 = arith.addf %411, %442 : vector<8x256xf32>
    %444 = vector.extract_strided_slice %4 {offsets = [0, 17], sizes = [8, 1], strides = [1, 1]} : vector<8x36xf32> to vector<8x1xf32>
    %445 = vector.extract_strided_slice %437 {offsets = [1, 0], sizes = [1, 256], strides = [1, 1]} : vector<8x256xf32> to vector<1x256xf32>
    %446 = vector.broadcast %444 : vector<8x1xf32> to vector<8x256xf32>
    %447 = vector.broadcast %445 : vector<1x256xf32> to vector<8x256xf32>
    %448 = arith.mulf %446, %447 : vector<8x256xf32>
    %449 = arith.addf %443, %448 : vector<8x256xf32>
    %450 = vector.extract_strided_slice %4 {offsets = [0, 26], sizes = [8, 1], strides = [1, 1]} : vector<8x36xf32> to vector<8x1xf32>
    %451 = vector.extract_strided_slice %437 {offsets = [2, 0], sizes = [1, 256], strides = [1, 1]} : vector<8x256xf32> to vector<1x256xf32>
    %452 = vector.broadcast %450 : vector<8x1xf32> to vector<8x256xf32>
    %453 = vector.broadcast %451 : vector<1x256xf32> to vector<8x256xf32>
    %454 = arith.mulf %452, %453 : vector<8x256xf32>
    %455 = arith.addf %449, %454 : vector<8x256xf32>
    %456 = vector.extract_strided_slice %4 {offsets = [0, 35], sizes = [8, 1], strides = [1, 1]} : vector<8x36xf32> to vector<8x1xf32>
    %457 = vector.extract_strided_slice %437 {offsets = [3, 0], sizes = [1, 256], strides = [1, 1]} : vector<8x256xf32> to vector<1x256xf32>
    %458 = vector.broadcast %456 : vector<8x1xf32> to vector<8x256xf32>
    %459 = vector.broadcast %457 : vector<1x256xf32> to vector<8x256xf32>
    %460 = arith.mulf %458, %459 : vector<8x256xf32>
    %461 = arith.addf %455, %460 : vector<8x256xf32>
    %462 = vector.extract_strided_slice %4 {offsets = [0, 8], sizes = [8, 1], strides = [1, 1]} : vector<8x36xf32> to vector<8x1xf32>
    %463 = vector.extract_strided_slice %437 {offsets = [4, 0], sizes = [1, 256], strides = [1, 1]} : vector<8x256xf32> to vector<1x256xf32>
    %464 = vector.broadcast %462 : vector<8x1xf32> to vector<8x256xf32>
    %465 = vector.broadcast %463 : vector<1x256xf32> to vector<8x256xf32>
    %466 = arith.mulf %464, %465 : vector<8x256xf32>
    %467 = arith.addf %435, %466 : vector<8x256xf32>
    %468 = vector.extract_strided_slice %4 {offsets = [0, 17], sizes = [8, 1], strides = [1, 1]} : vector<8x36xf32> to vector<8x1xf32>
    %469 = vector.extract_strided_slice %437 {offsets = [5, 0], sizes = [1, 256], strides = [1, 1]} : vector<8x256xf32> to vector<1x256xf32>
    %470 = vector.broadcast %468 : vector<8x1xf32> to vector<8x256xf32>
    %471 = vector.broadcast %469 : vector<1x256xf32> to vector<8x256xf32>
    %472 = arith.mulf %470, %471 : vector<8x256xf32>
    %473 = arith.addf %467, %472 : vector<8x256xf32>
    %474 = vector.extract_strided_slice %4 {offsets = [0, 26], sizes = [8, 1], strides = [1, 1]} : vector<8x36xf32> to vector<8x1xf32>
    %475 = vector.extract_strided_slice %437 {offsets = [6, 0], sizes = [1, 256], strides = [1, 1]} : vector<8x256xf32> to vector<1x256xf32>
    %476 = vector.broadcast %474 : vector<8x1xf32> to vector<8x256xf32>
    %477 = vector.broadcast %475 : vector<1x256xf32> to vector<8x256xf32>
    %478 = arith.mulf %476, %477 : vector<8x256xf32>
    %479 = arith.addf %473, %478 : vector<8x256xf32>
    %480 = vector.extract_strided_slice %4 {offsets = [0, 35], sizes = [8, 1], strides = [1, 1]} : vector<8x36xf32> to vector<8x1xf32>
    %481 = vector.extract_strided_slice %437 {offsets = [7, 0], sizes = [1, 256], strides = [1, 1]} : vector<8x256xf32> to vector<1x256xf32>
    %482 = vector.broadcast %480 : vector<8x1xf32> to vector<8x256xf32>
    %483 = vector.broadcast %481 : vector<1x256xf32> to vector<8x256xf32>
    %484 = arith.mulf %482, %483 : vector<8x256xf32>
    %485 = arith.addf %479, %484 : vector<8x256xf32>
    %486 = arith.addf %7, %163 : vector<8x256xf32>
    %487 = arith.addf %486, %312 : vector<8x256xf32>
    %488 = arith.addf %487, %461 : vector<8x256xf32>
    %cst_28 = arith.constant 0.000000e+00 : f32
    %489 = vector.broadcast %cst_28 : f32 to vector<8x256xf32>
    %490 = arith.maximumf %488, %489 : vector<8x256xf32>
    %c0_29 = arith.constant 0 : index
    %c0_30 = arith.constant 0 : index
    %491 = vector.load %arg4[%c0_29, %c0_30] : memref<16x256xf32, #tpu.memory_space<vmem>>, vector<8x256xf32>
    tpu.vector_store %arg4[%c0_29, %c0_30], %490 {strides = array<i32>} : memref<16x256xf32, #tpu.memory_space<vmem>>, vector<8x256xf32>,
    %492 = arith.addf %7, %187 : vector<8x256xf32>
    %493 = arith.addf %492, %336 : vector<8x256xf32>
    %494 = arith.addf %493, %485 : vector<8x256xf32>
    %cst_31 = arith.constant 0.000000e+00 : f32
    %495 = vector.broadcast %cst_31 : f32 to vector<8x256xf32>
    %496 = arith.maximumf %494, %495 : vector<8x256xf32>
    %c8 = arith.constant 8 : index
    %c0_32 = arith.constant 0 : index
    %497 = vector.load %arg4[%c8, %c0_32] : memref<16x256xf32, #tpu.memory_space<vmem>>, vector<8x256xf32>
    tpu.vector_store %arg4[%c8, %c0_32], %496 {strides = array<i32>} : memref<16x256xf32, #tpu.memory_space<vmem>>, vector<8x256xf32>,
    return
  }
  func.func @transform_0(%arg0: i32) -> (i32, i32) {
    %c0_i32 = arith.constant 0 : i32
    %c0_i32_0 = arith.constant 0 : i32
    %c0_i32_1 = arith.constant 0 : i32
    return %c0_i32, %c0_i32_0 : i32, i32
  }
  func.func @transform_1(%arg0: i32) -> (i32, i32) {
    %c0_i32 = arith.constant 0 : i32
    %c0_i32_0 = arith.constant 0 : i32
    %c0_i32_1 = arith.constant 0 : i32
    return %c0_i32, %c0_i32_0 : i32, i32
  }
  func.func @transform_2(%arg0: i32) -> (i32, i32) {
    %c0_i32 = arith.constant 0 : i32
    %c0_i32_0 = arith.constant 0 : i32
    %c0_i32_1 = arith.constant 0 : i32
    return %c0_i32, %c0_i32_0 : i32, i32
  }
  func.func @transform_3(%arg0: i32) -> (i32, i32) {
    %c0_i32 = arith.constant 0 : i32
    %c0_i32_0 = arith.constant 0 : i32
    %c0_i32_1 = arith.constant 0 : i32
    return %c0_i32, %c0_i32_0 : i32, i32
  }
}

</mosaic_0001>

<bundles_post_ra>
// kernel: feature_extractor_forward.1
= control target key start
LH: loop header
LB: loop body
LE: loop exit
PB: predicated region body
PF: predicated region fallthrough
CT: control target
= control target key end

     0   :  { %v29_v0 = vlaneseq  ;;  %v2364_v1 = vmov 0   ;;  %v2365_v7 = vmov 9   ;;  %v2366_v9 = vmov 18   ;;  %s2379_s16 = smov 127   ;;  %s2382_s21 = smov 126   ;;  %s3918_s2 = inlined_call_operand.vmem [shape: f32[8,1], index: 2, kind: input, shape index: {}]   ;;  %s3919_s1 = inlined_call_operand.vmem [shape: f32[8,36], index: 1, kind: input, shape index: {}]   ;;  %s3920_s0 = inlined_call_operand.vmem [shape: f32[8,256], index: 0, kind: input, shape index: {}]   ;;  %s3921_s3 = inlined_call_operand.vmem [shape: f32[16,256], index: 3, kind: output, shape index: {}]  }
   0x1   :  { %2295 = vset.pattern.permute.xlu1 %v2364_v1  ;;  %2294 = vset.pattern.permute.xlu0 %v2364_v1  ;;  %v23_v2 = vld [vmem:[%s3918_s2] sm:$0xff]  ;;  %v2367_v10 = vmov 0.0   ;;  %v2368_v14 = vmov 27   ;;  %v2370_v15 = vmov 1   ;;  %v2371_v16 = vmov 2   ;;  %s2375_s2 = smov 113  }
   0x2   :  { %v2436_v3 = vld [vmem:[%s3919_s1] sm:$0xff]  ;;  %26 = vperm.xlu0 %2294, %v23_v2   ;;  %v30_v4 = vand.u32 127, %v29_v0  ;;  %s2369_s1 = smov 111   ;;  %v2372_v17 = vmov 10   ;;  %v2373_v18 = vmov 19   ;;  %v2374_v21 = vmov 28  }
   0x3   :  { %87 = vperm.xlu1 %2295, %v2436_v3   ;;  %v2376_v23 = vmov 11   ;;  %v2377_v24 = vmov 20   ;;  %v2378_v25 = vmov 29   ;;  %v2380_v26 = vmov 12   ;;  %v2478_v33 = vld [vmem:[%s3920_s0] sm:$0xff]  ;;  %v2494_v37 = vld [vmem:[%s3920_s0 + $0x8] sm:$0xff] }
   0x4   :  { %v31_v5 = vadd.s32 128, %v30_v4  ;;  %v36_v6 = vand.u32 15, %v30_v4  ;;  %v2381_v27 = vmov 3   ;;  %v2468_v30 = vshrl.u32 %v29_v0, 7  ;;  %s2393_s22 = smov 17   ;;  %s2400_s23 = smov 1  }
   0x5   :  { %vm525_vm4 = vcmask 924672   ;;  %s2406_s24 = smov 15   ;;  %vm1120_vm5 = vcmask 7168   ;;  %vm1848_vm6 = vcmask 138240   ;;  %vm1404_vm7 = vcmask 121856   ;;  %s2409_s29 = smov 96  }
   0x6   :  { %v43_v8 = vand.u32 15, %v31_v5  ;;  %vm56_vm0 = vcmp.ne.s32.totalorder %v36_v6, 0  ;;  %2302 = vset.pattern.permute.xlu0 %v2366_v9  ;;  %vm62_vm2 = vcmp.ne.s32.totalorder %v36_v6, 15  ;;  %v2471_v31 = vsub.s32 0, %v2468_v30 }
   0x7   :  { %2296 = vset.pattern.permute.xlu1 %v2365_v7  ;;  %v2244_v11 = vsel %vm56_vm0, 1.0, %v2367_v10  ;;  %v2246_v19 = vsel %vm62_vm2, 1.0, %v2367_v10  ;;  %v2489_v36 = vsub.s32 1, %v2468_v30  ;;  %v2509_v43 = vsub.s32 2, %v2468_v30 }
   0x8   :  { %109 = vperm.xlu1 %2296, %v2436_v3   ;;  %vm57_vm1 = vcmp.ne.s32.totalorder %v43_v8, 0  ;;  %vm63_vm3 = vcmp.ne.s32.totalorder %v43_v8, 15  ;;  %v2482_v34 = vrot.slane %v2367_v10, %v2471_v31  ;;  %v2486_v35 = vrot.slane %v2478_v33, %v2471_v31 }
   0x9   :  { %v2245_v12 = vsel %vm57_vm1, 1.0, %v2367_v10  ;;  %v2247_v20 = vsel %vm63_vm3, 1.0, %v2367_v10  ;;  %v2500_v41 = vrot.slane %v2494_v37, %v2471_v31  ;;  %v2504_v42 = vrot.slane %v2478_v33, %v2489_v36 }
   0xa   :  { %v2443_v13 = vpack.i.bf16 %v2245_v12, %v2244_v11  ;;  %v2455_v22 = vpack.i.bf16 %v2247_v20, %v2246_v19  ;;  %v2516_v46 = vrot.slane %v2367_v10, %v2489_v36  ;;  %v2523_v48 = vrot.slane %v2478_v33, %v2509_v43 }
   0xb   :  { %v2530_v50 = vrot.slane %v2494_v37, %v2489_v36  ;;  %v2533_v51 = vsub.s32 3, %v2468_v30  ;;  %v2549_v56 = vrot.slane %v2367_v10, %v2509_v43  ;;  %v2552_v57 = vsub.s32 4, %v2468_v30 }
   0xc   :  { %2303 = vset.pattern.permute.xlu1 %v2368_v14  ;;  %2298 = vrot.lane.b32.xlu0 %v2443_v13, %s2369_s1  ;;  %v2567_v62 = vrot.slane %v2494_v37, %v2509_v43  ;;  %v2583_v4 = vsub.s32 5, %v2468_v30  ;;  %v2599_v9 = vsub.s32 6, %v2468_v30  ;;  %vm274_vm8 = vcmask 1039360  }
   0xd   :  { %153 = vperm.xlu1 %2303, %v2436_v3   ;;  %v2542_v54 = vrot.slane %v2478_v33, %v2533_v51  ;;  %v2561_v60 = vrot.slane %v2367_v10, %v2552_v57  ;;  %v2574_v0 = vrot.slane %v2494_v37, %v2552_v57  ;;  %v2580_v2 = vrot.slane %v2367_v10, %v2533_v51 }
   0xe   :  { %v2590_v6 = vrot.slane %v2478_v33, %v2583_v4  ;;  %v2596_v8 = vrot.slane %v2494_v37, %v2533_v51  ;;  %v2609_v14 = vrot.slane %v2367_v10, %v2599_v9  ;;  %v2623_v20 = vrot.slane %v2494_v37, %v2599_v9 }
   0xf   :  { %vm561_vm9 = vcmask 1031168   ;;  %vm77_vm10 = vcmask 908288   ;;  %vm2140_vm11 = vcmask 916480   ;;  %vm2158_vm12 = vcmask 785408  }
  0x10   :  { %131 = vperm.xlu0 %2302, %v2436_v3  }
  0x11   :  { %2304 = vset.pattern.permute.xlu1 %v2370_v15 }
  0x12   :  { %247 = vperm.xlu1 %2304, %v2436_v3  }
  0x14   :  { %2313 = vset.pattern.permute.xlu0 %v2371_v16  ;;  %v2615_v16 = vrot.slane %v2478_v33, %v2552_v57 }
  0x15   :  { %534 = vperm.xlu0 %2313, %v2436_v3  }
  0x16   :  { %2305 = vset.pattern.permute.xlu1 %v2372_v17 }
  0x17   :  { %284 = vperm.xlu1 %2305, %v2436_v3  }
  0x19   :  { %2322 = vset.pattern.permute.xlu0 %v2381_v27 }
  0x1b   :  { %2306 = vset.pattern.permute.xlu1 %v2373_v18 }
  0x1c   :  { %320 = vperm.xlu1 %2306, %v2436_v3  }
  0x20   :  { %2307 = vset.pattern.permute.xlu1 %v2374_v21 }
  0x21   :  { %356 = vperm.xlu1 %2307, %v2436_v3  }
  0x25   :  { %2309 = vrot.lane.b32.xlu1 %v2455_v22, %s2375_s2 }
  0x26   :  { %2314 = vset.pattern.permute.xlu1 %v2376_v23 }
  0x29   :  { %571 = vperm.xlu1 %2314, %v2436_v3  }
  0x2d   :  { %2315 = vset.pattern.permute.xlu1 %v2377_v24 }
  0x2e   :  { %607 = vperm.xlu1 %2315, %v2436_v3  }
  0x32   :  { %2316 = vset.pattern.permute.xlu1 %v2378_v25  ;;  %v2630_v25 = vrot.slane %v2367_v10, %v2583_v4 }
  0x33   :  { %643 = vperm.xlu1 %2316, %v2436_v3  }
  0x37   :  { %2318 = vrot.lane.b32.xlu1 %v2443_v13, %s2379_s16 }
  0x38   :  { %2323 = vset.pattern.permute.xlu1 %v2380_v26  ;;  %v2633_v26 = vsub.s32 7, %v2468_v30 }
  0x3a   :  { %3977 = vst [vmem:[#allocation8_spill] sm:$0xff] %v2633_v26 }
  0x81   :  { %v2602_v11 = vpop.permute.xlu0 %26 }
  0x82   :  { %v2463_v28 = vpop.permute.xlu1 %87  ;;  %3975 = vst [vmem:[#allocation6_spill] sm:$0xff] %v2602_v11 }
  0x83   :  { %3972 = vst [vmem:[#allocation3_spill] sm:$0xff] %v2463_v28 }
  0x85   :  { %v2625_v21 = vpop.permute.xlu0 %2298 }
  0x86   :  { %3976 = vst [vmem:[#allocation7_spill] sm:$0xff] %v2625_v21 }
  0x87   :  { %v2465_v29 = vpop.permute.xlu1 %109 }
  0x88   :  { %3973 = vst [vmem:[#allocation4_spill] sm:$0xff] %v2465_v29 }
  0x8c   :  { %v2473_v32 = vpop.permute.xlu1 %153 }
  0x8d   :  { %3974 = vst [vmem:[#allocation5_spill] sm:$0xff] %v2473_v32 }
  0x91   :  { %v248_v38 = vpop.permute.xlu1 %247 }
  0x92   :  { %v262_v39 = vmul.f32 %v2482_v34, %v248_v38  ;;  %v263_v40 = vmul.f32 %v2486_v35, %v248_v38  ;;  %v264_v45 = vmul.f32 %v2500_v41, %v248_v38  ;;  %v403_v63 = vmul.f32 %v2561_v60, %v248_v38 }
  0x93   :  { %v405_v5 = vmul.f32 %v2574_v0, %v248_v38  ;;  %v404_v24 = vmul.f32 %v2615_v16, %v248_v38  ;;  %v2643_v38 = vrot.slane %v2478_v33, %v2633_v26 }
  0x94   :  { %268 = vrot.lane.b32.xlu0 %v262_v39, %s2379_s16  ;;  %270 = vrot.lane.b32.xlu1 %v263_v40, %s2379_s16  ;;  %v2645_v40 = vpop.permute.xlu0 %131 }
  0x95   :  { %3978 = vst [vmem:[#allocation9_spill] sm:$0xff] %v2645_v40 }
  0x96   :  { %v2511_v44 = vpop.permute.xlu1 %284 }
  0x97   :  { %v300_v47 = vmul.f32 %v2504_v42, %v2511_v44  ;;  %v299_v49 = vmul.f32 %v2516_v46, %v2511_v44  ;;  %v301_v55 = vmul.f32 %v2530_v50, %v2511_v44  ;;  %v436_v12 = vmul.f32 %v2590_v6, %v2511_v44 }
  0x98   :  { %272 = vrot.lane.b32.xlu0 %v264_v45, %s2379_s16  ;;  %v435_v30 = vmul.f32 %v2630_v25, %v2511_v44 }
  0x99   :  { %307 = vrot.lane.b32.xlu1 %v300_v47, %s2379_s16  ;;  %v2651_v47 = vrot.slane %v2494_v37, %v2583_v4 }
  0x9b   :  { %v2535_v52 = vpop.permute.xlu1 %320 }
  0x9c   :  { %305 = vrot.lane.b32.xlu0 %v299_v49, %s2379_s16  ;;  %v336_v53 = vmul.f32 %v2523_v48, %v2535_v52  ;;  %v335_v61 = vmul.f32 %v2549_v56, %v2535_v52  ;;  %v337_v1 = vmul.f32 %v2567_v62, %v2535_v52  ;;  %v467_v19 = vmul.f32 %v2609_v14, %v2535_v52 }
  0x9d   :  { %v469_v39 = vmul.f32 %v2623_v20, %v2535_v52 }
  0x9e   :  { %343 = vrot.lane.b32.xlu1 %v336_v53, %s2379_s16 }
  0xa0   :  { %v2554_v58 = vpop.permute.xlu1 %356  ;;  %309 = vrot.lane.b32.xlu0 %v301_v55, %s2379_s16 }
  0xa1   :  { %v372_v59 = vmul.f32 %v2542_v54, %v2554_v58  ;;  %v371_v7 = vmul.f32 %v2580_v2, %v2554_v58  ;;  %v373_v15 = vmul.f32 %v2596_v8, %v2554_v58  ;;  %v500_v53 = vmul.f32 %v2643_v38, %v2554_v58 }
  0xa3   :  { %379 = vrot.lane.b32.xlu1 %v372_v59, %s2379_s16  ;;  %v2662_v59 = vpop.permute.xlu0 %534 }
  0xa4   :  { %341 = vrot.lane.b32.xlu0 %v335_v61, %s2379_s16  ;;  %v2310_v17 = vpop.permute.xlu1 %2309  ;;  %v437_v61 = vmul.f32 %v2651_v47, %v2511_v44  ;;  %v2681_v44 = vrot.slane %v2367_v10, %v2633_v26  ;;  %v2695_v10 = vrot.slane %v2494_v37, %v2633_v26 }
  0xa5   :  { %v2311_v18 = vunpack.i.l.bf16 %v2310_v17  ;;  %v2312_v23 = vunpack.i.h.bf16 %v2310_v17 }
  0xa7   :  { %409 = vrot.lane.b32.xlu1 %v403_v63, %s2379_s16  ;;  %v2637_v27 = vmul.f32 0.0, %v2311_v18  ;;  %v526_v45 = vsel %vm525_vm4, %v2311_v18, %v2312_v23  ;;  %v2668_v63 = vrot.slane %v2478_v33, %v2599_v9  ;;  %v2689_v18 = vmul.f32 %v2312_v23, %v2494_v37 }
  0xa8   :  { %345 = vrot.lane.b32.xlu0 %v337_v1, %s2379_s16  ;;  %v2656_v49 = vmul.f32 %v526_v45, %v2478_v33  ;;  %v501_v23 = vmul.f32 %v2695_v10, %v2554_v58 }
  0xa9   :  { %v540_v55 = vrot.slane %v2637_v27, %v2471_v31  ;;  %v548_v45 = vrot.slane %v2689_v18, %v2471_v31 }
  0xaa   :  { %v581_v17 = vrot.slane %v2656_v49, %v2489_v36 }
  0xab   :  { %413 = vrot.lane.b32.xlu1 %v405_v5, %s2379_s16  ;;  %v549_v1 = vmul.f32 %v540_v55, %v2662_v59  ;;  %v544_v5 = vrot.slane %v2656_v49, %v2471_v31 }
  0xac   :  { %377 = vrot.lane.b32.xlu0 %v371_v7, %s2379_s16  ;;  %v2675_v7 = vpop.permute.xlu1 %571 }
  0xaf   :  { %443 = vrot.lane.b32.xlu1 %v436_v12, %s2379_s16  ;;  %v468_v12 = vmul.f32 %v2668_v63, %v2535_v52  ;;  %v499_v52 = vmul.f32 %v2681_v44, %v2554_v58 }
  0xb0   :  { %381 = vrot.lane.b32.xlu0 %v373_v15, %s2379_s16  ;;  %v550_v15 = vmul.f32 %v544_v5, %v2662_v59  ;;  %v681_v5 = vrot.slane %v2637_v27, %v2552_v57 }
  0xb3   :  { %473 = vrot.lane.b32.xlu1 %v467_v19, %s2379_s16  ;;  %v2698_v19 = vpop.permute.xlu1 %607 }
  0xb4   :  { %411 = vrot.lane.b32.xlu0 %v404_v24, %s2379_s16  ;;  %v587_v24 = vmul.f32 %v581_v17, %v2675_v7  ;;  %v690_v17 = vmul.f32 %v681_v5, %v2662_v59  ;;  %v649_v5 = vrot.slane %v2637_v27, %v2533_v51 }
  0xb7   :  { %477 = vrot.lane.b32.xlu1 %v469_v39, %s2379_s16  ;;  %v617_v39 = vrot.slane %v2656_v49, %v2509_v43  ;;  %v2713_v55 = vpop.permute.xlu1 %643 }
  0xb8   :  { %441 = vrot.lane.b32.xlu0 %v435_v30, %s2379_s16 }
  0xb9   :  { %v623_v30 = vmul.f32 %v617_v39, %v2698_v19  ;;  %v613_v39 = vrot.slane %v2637_v27, %v2509_v43 }
  0xbb   :  { %507 = vrot.lane.b32.xlu1 %v500_v53, %s2379_s16  ;;  %v653_v53 = vrot.slane %v2656_v49, %v2533_v51 }
  0xbc   :  { %445 = vrot.lane.b32.xlu0 %v437_v61, %s2379_s16  ;;  %v551_v61 = vmul.f32 %v548_v45, %v2662_v59  ;;  %v717_v45 = vrot.slane %v2656_v49, %v2583_v4 }
  0xbd   :  { %v659_v58 = vmul.f32 %v653_v53, %v2713_v55  ;;  %v621_v53 = vrot.slane %v2689_v18, %v2509_v43 }
  0xbf   :  { %555 = vrot.lane.b32.xlu1 %v549_v1, %s2382_s21  ;;  %v577_v1 = vrot.slane %v2637_v27, %v2489_v36 }
  0xc0   :  { %475 = vrot.lane.b32.xlu0 %v468_v12, %s2379_s16 }
  0xc1   :  { %v586_v12 = vmul.f32 %v577_v1, %v2675_v7  ;;  %v745_v1 = vrot.slane %v2637_v27, %v2599_v9 }
  0xc3   :  { %557 = vrot.lane.b32.xlu1 %v550_v15, %s2382_s21  ;;  %v585_v15 = vrot.slane %v2689_v18, %v2489_v36 }
  0xc4   :  { %505 = vrot.lane.b32.xlu0 %v499_v52, %s2379_s16  ;;  %v689_v52 = vrot.slane %v2689_v18, %v2552_v57 }
  0xc7   :  { %594 = vrot.lane.b32.xlu1 %v587_v24, %s2382_s21  ;;  %v588_v24 = vmul.f32 %v585_v15, %v2675_v7  ;;  %v753_v15 = vrot.slane %v2689_v18, %v2599_v9 }
  0xc8   :  { %509 = vrot.lane.b32.xlu0 %v501_v23, %s2379_s16  ;;  %v692_v23 = vmul.f32 %v689_v52, %v2662_v59  ;;  %v657_v52 = vrot.slane %v2689_v18, %v2533_v51 }
  0xcb   :  { %630 = vrot.lane.b32.xlu1 %v623_v30, %s2382_s21  ;;  %v622_v30 = vmul.f32 %v613_v39, %v2698_v19  ;;  %v781_v39 = vrot.slane %v2656_v49, %v2633_v26 }
  0xcc   :  { %559 = vrot.lane.b32.xlu0 %v551_v61, %s2382_s21  ;;  %v723_v61 = vmul.f32 %v717_v45, %v2675_v7  ;;  %v685_v45 = vrot.slane %v2656_v49, %v2552_v57 }
  0xcf   :  { %666 = vrot.lane.b32.xlu1 %v659_v58, %s2382_s21  ;;  %v624_v58 = vmul.f32 %v621_v53, %v2698_v19  ;;  %v691_v53 = vmul.f32 %v685_v45, %v2662_v59  ;;  %v749_v59 = vrot.slane %v2656_v49, %v2599_v9  ;;  %v785_v49 = vrot.slane %v2689_v18, %v2633_v26 }
  0xd0   :  { %592 = vrot.lane.b32.xlu0 %v586_v12, %s2382_s21  ;;  %v754_v12 = vmul.f32 %v745_v1, %v2698_v19 }
  0xd3   :  { %696 = vrot.lane.b32.xlu1 %v690_v17, %s2382_s21  ;;  %v658_v17 = vmul.f32 %v649_v5, %v2713_v55 }
  0xd4   :  { %596 = vrot.lane.b32.xlu0 %v588_v24, %s2382_s21  ;;  %v756_v24 = vmul.f32 %v753_v15, %v2698_v19  ;;  %v755_v15 = vmul.f32 %v749_v59, %v2698_v19  ;;  %v788_v19 = vmul.f32 %v785_v49, %v2713_v55 }
  0xd7   :  { %700 = vrot.lane.b32.xlu1 %v692_v23, %s2382_s21  ;;  %v660_v23 = vmul.f32 %v657_v52, %v2713_v55  ;;  %v2384_v52 = vmov 4  }
  0xd8   :  { %628 = vrot.lane.b32.xlu0 %v622_v30, %s2382_s21  ;;  %v787_v30 = vmul.f32 %v781_v39, %v2713_v55  ;;  %v2386_v39 = vmov 30  }
  0xdb   :  { %730 = vrot.lane.b32.xlu1 %v723_v61, %s2382_s21  ;;  %v713_v61 = vrot.slane %v2637_v27, %v2583_v4 }
  0xdc   :  { %632 = vrot.lane.b32.xlu0 %v624_v58, %s2382_s21  ;;  %v721_v58 = vrot.slane %v2689_v18, %v2583_v4 }
  0xdd   :  { %v722_v1 = vmul.f32 %v713_v61, %v2675_v7 }
  0xde   :  { %v724_v5 = vmul.f32 %v721_v58, %v2675_v7 }
  0xdf   :  { %760 = vrot.lane.b32.xlu1 %v754_v12, %s2382_s21  ;;  %v2383_v12 = vmov 21  }
  0xe0   :  { %664 = vrot.lane.b32.xlu0 %v658_v17, %s2382_s21  ;;  %v777_v17 = vrot.slane %v2637_v27, %v2633_v26  ;;  %v2796_v27 = vpop.permute.xlu1 %2318 }
  0xe2   :  { %v786_v7 = vmul.f32 %v777_v17, %v2713_v55 }
  0xe3   :  { %764 = vrot.lane.b32.xlu1 %v756_v24, %s2382_s21  ;;  %v2385_v24 = vmov 13  }
  0xe4   :  { %668 = vrot.lane.b32.xlu0 %v660_v23, %s2382_s21 }
  0xe7   :  { %794 = vrot.lane.b32.xlu1 %v787_v30, %s2382_s21 }
  0xe8   :  { %698 = vrot.lane.b32.xlu0 %v691_v53, %s2382_s21 }
  0xeb   :  { %840 = vperm.xlu1 %2323, %v2436_v3  }
  0xec   :  { %728 = vrot.lane.b32.xlu0 %v722_v1, %s2382_s21 }
  0xef   :  { %2324 = vset.pattern.permute.xlu1 %v2383_v12 }
  0xf0   :  { %732 = vrot.lane.b32.xlu0 %v724_v5, %s2382_s21  ;;  %862 = vperm.xlu1 %2324, %v2436_v3  }
  0xf4   :  { %762 = vrot.lane.b32.xlu0 %v755_v15, %s2382_s21  ;;  %2326 = vset.pattern.permute.xlu1 %v2384_v52 }
  0xf5   :  { %978 = vperm.xlu1 %2326, %v2436_v3  }
  0xf8   :  { %792 = vrot.lane.b32.xlu0 %v786_v7, %s2382_s21 }
  0xf9   :  { %2327 = vset.pattern.permute.xlu1 %v2385_v24 }
  0xfc   :  { %796 = vrot.lane.b32.xlu0 %v788_v19, %s2382_s21 }
 0x100   :  { %818 = vperm.xlu0 %2322, %v2436_v3  }
 0x104   :  { %2325 = vset.pattern.permute.xlu0 %v2386_v39 }
 0x105   :  { %884 = vperm.xlu0 %2325, %v2436_v3  }
 0x106   :  { %v2799_v23 = vpop.permute.xlu1 %270 }
 0x107   :  { %3979 = vst [vmem:[#allocation10_spill] sm:$0xff] %v2799_v23 }
 0x10b   :  { %v2801_v45 = vpop.permute.xlu1 %307 }
 0x10c   :  { %3980 = vst [vmem:[#allocation11_spill] sm:$0xff] %v2801_v45 }
 0x110   :  { %v2803_v18 = vpop.permute.xlu1 %343 }
 0x111   :  { %3981 = vst [vmem:[#allocation12_spill] sm:$0xff] %v2803_v18 }
 0x115   :  { %v2805_v30 = vpop.permute.xlu1 %379 }
 0x116   :  { %3982 = vst [vmem:[#allocation13_spill] sm:$0xff] %v2805_v30 }
 0x119   :  { %v2807_v53 = vpop.permute.xlu1 %409 }
 0x11a   :  { %3983 = vst [vmem:[#allocation14_spill] sm:$0xff] %v2807_v53 }
 0x11d   :  { %v2809_v55 = vpop.permute.xlu1 %413 }
 0x11e   :  { %3984 = vst [vmem:[#allocation15_spill] sm:$0xff] %v2809_v55 }
 0x121   :  { %v2811_v61 = vpop.permute.xlu1 %443 }
 0x122   :  { %3985 = vst [vmem:[#allocation16_spill] sm:$0xff] %v2811_v61 }
 0x125   :  { %v2813_v1 = vpop.permute.xlu1 %473 }
 0x126   :  { %3986 = vst [vmem:[#allocation17_spill] sm:$0xff] %v2813_v1 }
 0x129   :  { %v2815_v58 = vpop.permute.xlu1 %477 }
 0x12a   :  { %3987 = vst [vmem:[#allocation18_spill] sm:$0xff] %v2815_v58 }
 0x12d   :  { %v2817_v5 = vpop.permute.xlu1 %507 }
 0x12e   :  { %3988 = vst [vmem:[#allocation19_spill] sm:$0xff] %v2817_v5 }
 0x131   :  { %v2819_v59 = vpop.permute.xlu1 %555 }
 0x132   :  { %3989 = vst [vmem:[#allocation20_spill] sm:$0xff] %v2819_v59 }
 0x135   :  { %v2821_v12 = vpop.permute.xlu1 %557 }
 0x136   :  { %3990 = vst [vmem:[#allocation21_spill] sm:$0xff] %v2821_v12 }
 0x139   :  { %v2823_v15 = vpop.permute.xlu1 %594 }
 0x13a   :  { %3991 = vst [vmem:[#allocation22_spill] sm:$0xff] %v2823_v15 }
 0x13d   :  { %v2825_v17 = vpop.permute.xlu1 %630 }
 0x13e   :  { %3992 = vst [vmem:[#allocation23_spill] sm:$0xff] %v2825_v17 }
 0x141   :  { %v2827_v52 = vpop.permute.xlu1 %666 }
 0x142   :  { %3993 = vst [vmem:[#allocation24_spill] sm:$0xff] %v2827_v52 }
 0x145   :  { %v2829_v7 = vpop.permute.xlu1 %696 }
 0x146   :  { %3994 = vst [vmem:[#allocation25_spill] sm:$0xff] %v2829_v7 }
 0x149   :  { %v2831_v49 = vpop.permute.xlu1 %700 }
 0x14a   :  { %3995 = vst [vmem:[#allocation26_spill] sm:$0xff] %v2831_v49 }
 0x14d   :  { %v2833_v24 = vpop.permute.xlu1 %730 }
 0x14e   :  { %3996 = vst [vmem:[#allocation27_spill] sm:$0xff] %v2833_v24 }
 0x151   :  { %v2835_v19 = vpop.permute.xlu1 %760 }
 0x152   :  { %3997 = vst [vmem:[#allocation28_spill] sm:$0xff] %v2835_v19 }
 0x155   :  { %v2837_v39 = vpop.permute.xlu1 %764 }
 0x156   :  { %3998 = vst [vmem:[#allocation29_spill] sm:$0xff] %v2837_v39  ;;  %v2387_v39 = vmov 22  }
 0x157   :  { %2328 = vset.pattern.permute.xlu0 %v2387_v39 }
 0x159   :  { %v2839_v11 = vpop.permute.xlu1 %794 }
 0x15a   :  { %3999 = vst [vmem:[#allocation30_spill] sm:$0xff] %v2839_v11  ;;  %v2854_v11 = vpop.permute.xlu0 %268 }
 0x15b   :  { %4000 = vst [vmem:[#allocation31_spill] sm:$0xff] %v2854_v11 }
 0x15e   :  { %v2856_v19 = vpop.permute.xlu0 %272 }
 0x15f   :  { %4001 = vst [vmem:[#allocation32_spill] sm:$0xff] %v2856_v19 }
 0x162   :  { %v2858_v24 = vpop.permute.xlu0 %305 }
 0x163   :  { %4002 = vst [vmem:[#allocation33_spill] sm:$0xff] %v2858_v24 }
 0x166   :  { %v2860_v7 = vpop.permute.xlu0 %309 }
 0x167   :  { %4003 = vst [vmem:[#allocation34_spill] sm:$0xff] %v2860_v7 }
 0x16a   :  { %v2841_v5 = vpop.permute.xlu1 %840  ;;  %v2862_v17 = vpop.permute.xlu0 %341 }
 0x16b   :  { %4004 = vst [vmem:[#allocation35_spill] sm:$0xff] %v2862_v17 }
 0x16e   :  { %v2864_v15 = vpop.permute.xlu0 %345 }
 0x16f   :  { %v2843_v58 = vpop.permute.xlu1 %862  ;;  %4005 = vst [vmem:[#allocation36_spill] sm:$0xff] %v2864_v15 }
 0x172   :  { %v2866_v61 = vpop.permute.xlu0 %377 }
 0x173   :  { %4006 = vst [vmem:[#allocation37_spill] sm:$0xff] %v2866_v61  ;;  %v2388_v61 = vmov 31  }
 0x174   :  { %v2845_v1 = vpop.permute.xlu1 %978 }
 0x175   :  { %v982_v52 = vmul.f32 %v2845_v1, %v2500_v41  ;;  %v981_v49 = vmul.f32 %v2845_v1, %v2486_v35  ;;  %v1054_v19 = vmul.f32 %v2845_v1, %v2574_v0 }
 0x177   :  { %987 = vrot.lane.b32.xlu0 %v982_v52, %s2379_s16  ;;  %985 = vrot.lane.b32.xlu1 %v981_v49, %s2379_s16  ;;  %v2870_v49 = vpop.permute.xlu0 %381 }
 0x178   :  { %4008 = vst [vmem:[#allocation39_spill] sm:$0xff] %v2870_v49  ;;  %v1053_v49 = vmul.f32 %v2845_v1, %v2615_v16  ;;  %v2398_v1 = vmov 25  }
 0x17b   :  { %997 = vperm.xlu1 %2327, %v2436_v3   ;;  %v2880_v55 = vpop.permute.xlu0 %411 }
 0x17c   :  { %4009 = vst [vmem:[#allocation40_spill] sm:$0xff] %v2880_v55 }
 0x17f   :  { %v2883_v53 = vpop.permute.xlu0 %441 }
 0x180   :  { %4010 = vst [vmem:[#allocation41_spill] sm:$0xff] %v2883_v53  ;;  %v2390_v53 = vmov 5  }
 0x183   :  { %v2888_v30 = vpop.permute.xlu0 %445 }
 0x184   :  { %4011 = vst [vmem:[#allocation42_spill] sm:$0xff] %v2888_v30  ;;  %v2391_v30 = vmov 16  }
 0x185   :  { %2331 = vset.pattern.permute.xlu1 %v2391_v30  ;;  %v2396_v30 = vmov 24  }
 0x187   :  { %v2894_v55 = vpop.permute.xlu0 %475 }
 0x188   :  { %4012 = vst [vmem:[#allocation43_spill] sm:$0xff] %v2894_v55 }
 0x1e9   :  { %v2868_v52 = vpop.permute.xlu1 %985 }
 0x1ea   :  { %4007 = vst [vmem:[#allocation38_spill] sm:$0xff] %v2868_v52 }
 0x1fa   :  { %v2872_v59 = vpop.permute.xlu1 %997 }
 0x1fb   :  { %v1001_v39 = vmul.f32 %v2872_v59, %v2530_v50  ;;  %v1000_v12 = vmul.f32 %v2872_v59, %v2504_v42 }
 0x1fd   :  { %1006 = vrot.lane.b32.xlu1 %v1001_v39, %s2379_s16  ;;  %1004 = vrot.lane.b32.xlu0 %v1000_v12, %s2379_s16  ;;  %v2389_v39 = vmov 7   ;;  %v1068_v12 = vmul.f32 %v2872_v59, %v2590_v6 }
 0x201   :  { %1016 = vperm.xlu0 %2328, %v2436_v3  }
 0x205   :  { %2329 = vset.pattern.permute.xlu0 %v2388_v61  ;;  %v2897_v61 = vpop.permute.xlu0 %505 }
 0x206   :  { %1035 = vperm.xlu0 %2329, %v2436_v3   ;;  %4013 = vst [vmem:[#allocation44_spill] sm:$0xff] %v2897_v61  ;;  %v2395_v61 = vmov 6  }
 0x20a   :  { %1057 = vrot.lane.b32.xlu0 %v1053_v49, %s2379_s16  ;;  %v2392_v49 = vmov 14  }
 0x20b   :  { %2330 = vset.pattern.permute.xlu0 %v2389_v39  ;;  %v2900_v39 = vpop.permute.xlu0 %509 }
 0x20c   :  { %4014 = vst [vmem:[#allocation45_spill] sm:$0xff] %v2900_v39 }
 0x20e   :  { %1072 = vrot.lane.b32.xlu0 %v1068_v12, %s2379_s16  ;;  %v2394_v12 = vmov 32  }
 0x20f   :  { %v2905_v55 = vpop.permute.xlu0 %559 }
 0x210   :  { %4015 = vst [vmem:[#allocation46_spill] sm:$0xff] %v2905_v55 }
 0x212   :  { %1573 = vperm.xlu0 %2330, %v2436_v3  }
 0x216   :  { %2333 = vset.pattern.permute.xlu0 %v2390_v53  ;;  %v2908_v53 = vpop.permute.xlu0 %592 }
 0x217   :  { %1129 = vperm.xlu0 %2333, %v2436_v3   ;;  %4016 = vst [vmem:[#allocation47_spill] sm:$0xff] %v2908_v53 }
 0x21b   :  { %2340 = vset.pattern.permute.xlu0 %v2392_v49  ;;  %v2911_v49 = vpop.permute.xlu0 %596 }
 0x21c   :  { %1165 = vperm.xlu0 %2340, %v2436_v3   ;;  %4017 = vst [vmem:[#allocation48_spill] sm:$0xff] %v2911_v49 }
 0x21f   :  { %v2914_v39 = vpop.permute.xlu0 %628 }
 0x220   :  { %2344 = vrot.lane.b32.xlu0 %v2455_v22, %s2393_s22  ;;  %4018 = vst [vmem:[#allocation49_spill] sm:$0xff] %v2914_v39 }
 0x221   :  { %2349 = vset.pattern.permute.xlu0 %v2394_v12  ;;  %v2397_v12 = vmov 35  }
 0x223   :  { %v2916_v15 = vpop.permute.xlu0 %632 }
 0x224   :  { %1237 = vperm.xlu0 %2349, %v2436_v3   ;;  %4019 = vst [vmem:[#allocation50_spill] sm:$0xff] %v2916_v15 }
 0x227   :  { %v2918_v55 = vpop.permute.xlu0 %664 }
 0x228   :  { %2352 = vset.pattern.permute.xlu0 %v2395_v61  ;;  %4020 = vst [vmem:[#allocation51_spill] sm:$0xff] %v2918_v55 }
 0x229   :  { %1413 = vperm.xlu0 %2352, %v2436_v3  }
 0x22b   :  { %v2920_v17 = vpop.permute.xlu0 %668 }
 0x22c   :  { %4021 = vst [vmem:[#allocation52_spill] sm:$0xff] %v2920_v17 }
 0x22d   :  { %2359 = vset.pattern.permute.xlu0 %v2396_v30 }
 0x22e   :  { %1457 = vperm.xlu0 %2359, %v2436_v3  }
 0x22f   :  { %v2922_v53 = vpop.permute.xlu0 %698 }
 0x230   :  { %4022 = vst [vmem:[#allocation53_spill] sm:$0xff] %v2922_v53 }
 0x232   :  { %2361 = vset.pattern.permute.xlu0 %v2397_v12 }
 0x233   :  { %v2924_v61 = vpop.permute.xlu0 %728 }
 0x234   :  { %4023 = vst [vmem:[#allocation54_spill] sm:$0xff] %v2924_v61 }
 0x237   :  { %v2926_v18 = vpop.permute.xlu0 %732 }
 0x238   :  { %4024 = vst [vmem:[#allocation55_spill] sm:$0xff] %v2926_v18 }
 0x23b   :  { %v2928_v30 = vpop.permute.xlu0 %762 }
 0x23c   :  { %4025 = vst [vmem:[#allocation56_spill] sm:$0xff] %v2928_v30 }
 0x23f   :  { %v2930_v49 = vpop.permute.xlu0 %792 }
 0x240   :  { %4026 = vst [vmem:[#allocation57_spill] sm:$0xff] %v2930_v49 }
 0x243   :  { %v2932_v7 = vpop.permute.xlu0 %796 }
 0x244   :  { %4027 = vst [vmem:[#allocation58_spill] sm:$0xff] %v2932_v7 }
 0x247   :  { %v2934_v39 = vpop.permute.xlu0 %818 }
 0x24b   :  { %v2936_v15 = vpop.permute.xlu0 %884 }
 0x24f   :  { %v2938_v24 = vpop.permute.xlu0 %987 }
 0x250   :  { %4028 = vst [vmem:[#allocation59_spill] sm:$0xff] %v2938_v24 }
 0x26f   :  { %v2940_v55 = vpop.permute.xlu0 %1004 }
 0x270   :  { %4029 = vst [vmem:[#allocation60_spill] sm:$0xff] %v2940_v55 }
 0x280   :  { %v1017_v17 = vpop.permute.xlu0 %1016 }
 0x281   :  { %v1019_v53 = vmul.f32 %v1017_v17, %v2523_v48  ;;  %v1020_v30 = vmul.f32 %v1017_v17, %v2567_v62 }
 0x283   :  { %1023 = vrot.lane.b32.xlu1 %v1019_v53, %s2379_s16 }
 0x285   :  { %v2944_v18 = vpop.permute.xlu0 %1035 }
 0x286   :  { %v1038_v7 = vmul.f32 %v2944_v18, %v2542_v54  ;;  %v1039_v45 = vmul.f32 %v2944_v18, %v2596_v8 }
 0x287   :  { %1025 = vrot.lane.b32.xlu1 %v1020_v30, %s2379_s16 }
 0x289   :  { %v2950_v49 = vpop.permute.xlu0 %1057 }
 0x28b   :  { %1042 = vrot.lane.b32.xlu1 %v1038_v7, %s2379_s16  ;;  %v1069_v7 = vmul.f32 %v2872_v59, %v2651_v47  ;;  %v2403_v59 = vmov 17  }
 0x28d   :  { %v2953_v61 = vpop.permute.xlu0 %1072 }
 0x28f   :  { %1044 = vrot.lane.b32.xlu1 %v1039_v45, %s2379_s16 }
 0x291   :  { %v1574_v53 = vpop.permute.xlu0 %1573 }
 0x292   :  { %v1589_v30 = vmul.f32 %v1574_v53, %v2500_v41  ;;  %v1728_v11 = vmul.f32 %v1574_v53, %v2615_v16  ;;  %v1730_v45 = vmul.f32 %v1574_v53, %v2561_v60  ;;  %v1084_v41 = vmul.f32 %v1017_v17, %v2623_v20 }
 0x293   :  { %1059 = vrot.lane.b32.xlu1 %v1054_v19, %s2379_s16  ;;  %v2399_v16 = vmov 34   ;;  %v2401_v60 = vmov 8   ;;  %v2404_v19 = vmov 26  }
 0x294   :  { %1596 = vrot.lane.b32.xlu0 %v1589_v30, %s2379_s16  ;;  %v2407_v30 = vmov 33  }
 0x297   :  { %1074 = vrot.lane.b32.xlu1 %v1069_v7, %s2379_s16  ;;  %v1588_v7 = vmul.f32 %v1574_v53, %v2486_v35 }
 0x298   :  { %1734 = vrot.lane.b32.xlu0 %v1728_v11, %s2379_s16  ;;  %v2402_v11 = vmov 23  }
 0x29b   :  { %1609 = vperm.xlu1 %2331, %v2436_v3  }
 0x29c   :  { %1738 = vrot.lane.b32.xlu0 %v1730_v45, %s2379_s16  ;;  %v1590_v45 = vmul.f32 %v1574_v53, %v2482_v34 }
 0x29f   :  { %2332 = vset.pattern.permute.xlu1 %v2398_v1 }
 0x2a0   :  { %1645 = vperm.xlu1 %2332, %v2436_v3   ;;  %1089 = vrot.lane.b32.xlu0 %v1084_v41, %s2379_s16  ;;  %v1083_v41 = vmul.f32 %v1017_v17, %v2668_v63 }
 0x2a4   :  { %2334 = vset.pattern.permute.xlu1 %v2399_v16 }
 0x2a5   :  { %1681 = vperm.xlu1 %2334, %v2436_v3  }
 0x2a9   :  { %2336 = vrot.lane.b32.xlu1 %v2455_v22, %s2400_s23  ;;  %v2405_v22 = vmov 15  }
 0x2aa   :  { %2341 = vset.pattern.permute.xlu1 %v2401_v60 }
 0x2ad   :  { %1857 = vperm.xlu1 %2341, %v2436_v3  }
 0x2b1   :  { %2342 = vset.pattern.permute.xlu1 %v2402_v11 }
 0x2b2   :  { %1201 = vperm.xlu1 %2342, %v2436_v3  }
 0x2b6   :  { %2348 = vset.pattern.permute.xlu1 %v2403_v59 }
 0x2b7   :  { %1893 = vperm.xlu1 %2348, %v2436_v3  }
 0x2bb   :  { %2350 = vset.pattern.permute.xlu1 %v2404_v19 }
 0x2bc   :  { %1929 = vperm.xlu1 %2350, %v2436_v3  }
 0x2c0   :  { %2351 = vset.pattern.permute.xlu1 %v2397_v12  ;;  %v1729_v12 = vmul.f32 %v1574_v53, %v2574_v0 }
 0x2c1   :  { %1965 = vperm.xlu1 %2351, %v2436_v3  }
 0x2c5   :  { %2353 = vset.pattern.permute.xlu1 %v2405_v22 }
 0x2c6   :  { %1435 = vperm.xlu1 %2353, %v2436_v3  }
 0x2ca   :  { %2355 = vrot.lane.b32.xlu1 %v2443_v13, %s2406_s24  ;;  %v2992_v13 = vpop.permute.xlu1 %1006 }
 0x2cb   :  { %2360 = vset.pattern.permute.xlu1 %v2407_v30  ;;  %4030 = vst [vmem:[#allocation61_spill] sm:$0xff] %v2992_v13 }
 0x2ce   :  { %1479 = vperm.xlu1 %2360, %v2436_v3  }
 0x2d2   :  { %1594 = vrot.lane.b32.xlu1 %v1588_v7, %s2379_s16 }
 0x2d6   :  { %1598 = vrot.lane.b32.xlu1 %v1590_v45, %s2379_s16 }
 0x2da   :  { %1736 = vrot.lane.b32.xlu1 %v1729_v12, %s2379_s16 }
 0x2de   :  { %1087 = vrot.lane.b32.xlu1 %v1083_v41, %s2379_s16 }
 0x2f5   :  { %v2994_v1 = vpop.permute.xlu1 %1023 }
 0x2f6   :  { %4031 = vst [vmem:[#allocation62_spill] sm:$0xff] %v2994_v1 }
 0x2f9   :  { %v2996_v3 = vpop.permute.xlu1 %1025 }
 0x2fa   :  { %4032 = vst [vmem:[#allocation63_spill] sm:$0xff] %v2996_v3 }
 0x2fd   :  { %v2998_v35 = vpop.permute.xlu1 %1042 }
 0x2fe   :  { %4033 = vst [vmem:[#allocation64_spill] sm:$0xff] %v2998_v35 }
 0x301   :  { %v3000_v16 = vpop.permute.xlu1 %1044 }
 0x302   :  { %4034 = vst [vmem:[#allocation65_spill] sm:$0xff] %v3000_v16 }
 0x305   :  { %v3002_v34 = vpop.permute.xlu1 %1059 }
 0x309   :  { %v3004_v60 = vpop.permute.xlu1 %1074 }
 0x30a   :  { %4035 = vst [vmem:[#allocation66_spill] sm:$0xff] %v3004_v60 }
 0x31a   :  { %v1610_v0 = vpop.permute.xlu1 %1609 }
 0x31b   :  { %v1625_v53 = vmul.f32 %v1610_v0, %v2530_v50  ;;  %v1624_v17 = vmul.f32 %v1610_v0, %v2504_v42  ;;  %v1760_v11 = vmul.f32 %v1610_v0, %v2590_v6  ;;  %v1626_v59 = vmul.f32 %v1610_v0, %v2516_v46 }
 0x31c   :  { %v1762_v22 = vmul.f32 %v1610_v0, %v2630_v25  ;;  %v1761_v30 = vmul.f32 %v1610_v0, %v2651_v47  ;;  %v1099_v42 = vmul.f32 %v2944_v18, %v2695_v10  ;;  %v1098_v46 = vmul.f32 %v2944_v18, %v2643_v38  ;;  %v1130_v0 = vpop.permute.xlu0 %1129 }
 0x31d   :  { %1632 = vrot.lane.b32.xlu0 %v1625_v53, %s2379_s16  ;;  %1630 = vrot.lane.b32.xlu1 %v1624_v17, %s2379_s16 }
 0x31f   :  { %v1646_v19 = vpop.permute.xlu1 %1645 }
 0x320   :  { %v1661_v45 = vmul.f32 %v1646_v19, %v2567_v62  ;;  %v1660_v12 = vmul.f32 %v1646_v19, %v2523_v48  ;;  %v1792_v17 = vmul.f32 %v1646_v19, %v2668_v63  ;;  %v1794_v63 = vmul.f32 %v1646_v19, %v2609_v14 }
 0x321   :  { %1766 = vrot.lane.b32.xlu0 %v1760_v11, %s2379_s16  ;;  %1634 = vrot.lane.b32.xlu1 %v1626_v59, %s2379_s16  ;;  %v1662_v11 = vmul.f32 %v1646_v19, %v2549_v56  ;;  %v1793_v56 = vmul.f32 %v1646_v19, %v2623_v20 }
 0x324   :  { %v3016_v50 = vpop.permute.xlu1 %1681 }
 0x325   :  { %1770 = vrot.lane.b32.xlu0 %v1762_v22, %s2379_s16  ;;  %1768 = vrot.lane.b32.xlu1 %v1761_v30, %s2379_s16  ;;  %v3048_v22 = vpop.permute.xlu0 %1165 }
 0x328   :  { %v2337_v6 = vpop.permute.xlu1 %2336 }
 0x329   :  { %1104 = vrot.lane.b32.xlu0 %v1099_v42, %s2379_s16  ;;  %1102 = vrot.lane.b32.xlu1 %v1098_v46, %s2379_s16  ;;  %v2339_v25 = vunpack.i.h.bf16 %v2337_v6  ;;  %v2338_v47 = vunpack.i.l.bf16 %v2337_v6 }
 0x32b   :  { %v1121_v7 = vsel %vm1120_vm5, %v2338_v47, %v2339_v25  ;;  %v3031_v53 = vmul.f32 %v2338_v47, %v2478_v33  ;;  %v3050_v30 = vmul.f32 0.0, %v2339_v25  ;;  %v2345_v25 = vpop.permute.xlu0 %2344 }
 0x32c   :  { %v3028_v41 = vpop.permute.xlu1 %1857  ;;  %v3034_v18 = vmul.f32 %v1121_v7, %v2494_v37  ;;  %v2347_v14 = vunpack.i.h.bf16 %v2345_v25  ;;  %v2346_v20 = vunpack.i.l.bf16 %v2345_v25  ;;  %v1696_v25 = vmul.f32 %v3016_v50, %v2542_v54 }
 0x32d   :  { %1668 = vrot.lane.b32.xlu0 %v1661_v45, %s2379_s16  ;;  %1666 = vrot.lane.b32.xlu1 %v1660_v12, %s2379_s16  ;;  %v1135_v59 = vrot.slane %v3031_v53, %v2471_v31  ;;  %v1275_v47 = vrot.slane %v3031_v53, %v2552_v57  ;;  %v1143_v7 = vrot.slane %v3050_v30, %v2471_v31 }
 0x32e   :  { %v1139_v62 = vrot.slane %v3034_v18, %v2471_v31  ;;  %v1824_v54 = vmul.f32 %v3016_v50, %v2643_v38  ;;  %v1311_v23 = vrot.slane %v3034_v18, %v2583_v4 }
 0x32f   :  { %v1144_v46 = vmul.f32 %v1135_v59, %v1130_v0  ;;  %v1284_v45 = vmul.f32 %v1275_v47, %v1130_v0  ;;  %v1146_v12 = vmul.f32 %v1143_v7, %v1130_v0  ;;  %v3073_v59 = vpop.permute.xlu0 %1237  ;;  %v1697_v7 = vmul.f32 %v3016_v50, %v2596_v8 }
 0x330   :  { %v1145_v42 = vmul.f32 %v1139_v62, %v1130_v0  ;;  %v1849_v62 = vsel %vm1848_vm6, %v2346_v20, %v2347_v14 }
 0x331   :  { %1798 = vrot.lane.b32.xlu0 %v1792_v17, %s2379_s16  ;;  %1670 = vrot.lane.b32.xlu1 %v1662_v11, %s2379_s16  ;;  %v3042_v48 = vpop.permute.xlu1 %1201  ;;  %v1283_v17 = vrot.slane %v3050_v30, %v2552_v57  ;;  %v1279_v11 = vrot.slane %v3034_v18, %v2552_v57  ;;  %v3083_v47 = vmul.f32 %v1849_v62, %v2494_v37 }
 0x332   :  { %v1307_v62 = vrot.slane %v3031_v53, %v2583_v4 }
 0x333   :  { %v1867_v8 = vrot.slane %v3083_v47, %v2471_v31 }
 0x335   :  { %1802 = vrot.lane.b32.xlu0 %v1794_v63, %s2379_s16  ;;  %1800 = vrot.lane.b32.xlu1 %v1793_v56, %s2379_s16  ;;  %v1286_v63 = vmul.f32 %v1283_v17, %v1130_v0  ;;  %v1285_v56 = vmul.f32 %v1279_v11, %v1130_v0  ;;  %v3091_v0 = vpop.permute.xlu0 %1413  ;;  %v1171_v11 = vrot.slane %v3031_v53, %v2489_v36 }
 0x336   :  { %v3056_v6 = vpop.permute.xlu1 %1893  ;;  %v3136_v28 = vmul.f32 %v1867_v8, %v3028_v41  ;;  %v1317_v8 = vmul.f32 %v1311_v23, %v3048_v22 }
 0x339   :  { %1152 = vrot.lane.b32.xlu0 %v1145_v42, %s2382_s21  ;;  %1150 = vrot.lane.b32.xlu1 %v1144_v46, %s2382_s21  ;;  %v3080_v46 = vmul.f32 %v2346_v20, %v2478_v33  ;;  %v1175_v20 = vrot.slane %v3034_v18, %v2489_v36  ;;  %v3128_v29 = vpop.permute.xlu0 %1457 }
 0x33b   :  { %v3064_v19 = vpop.permute.xlu1 %1929  ;;  %v1863_v17 = vrot.slane %v3080_v46, %v2471_v31  ;;  %v1181_v40 = vmul.f32 %v1175_v20, %v3048_v22 }
 0x33d   :  { %1290 = vrot.lane.b32.xlu0 %v1284_v45, %s2382_s21  ;;  %1154 = vrot.lane.b32.xlu1 %v1146_v12, %s2382_s21  ;;  %v3089_v45 = vmul.f32 0.0, %v2347_v14  ;;  %v1698_v14 = vmul.f32 %v3016_v50, %v2580_v2  ;;  %v1826_v2 = vmul.f32 %v3016_v50, %v2681_v44  ;;  %v3133_v44 = vmul.f32 %v1863_v17, %v3028_v41  ;;  %v1597_v35 = vpop.permute.xlu0 %1596 }
 0x340   :  { %v3075_v42 = vpop.permute.xlu1 %1965 }
 0x341   :  { %4036 = vst [vmem:[#allocation67_spill] sm:$0xff] %v3075_v42  ;;  %1294 = vrot.lane.b32.xlu0 %v1286_v63, %s2382_s21  ;;  %1292 = vrot.lane.b32.xlu1 %v1285_v56, %s2382_s21  ;;  %v1179_v63 = vrot.slane %v3050_v30, %v2489_v36 }
 0x345   :  { %v3093_v12 = vpop.permute.xlu1 %1435  ;;  %1704 = vrot.lane.b32.xlu0 %v1697_v7, %s2379_s16  ;;  %1702 = vrot.lane.b32.xlu1 %v1696_v25, %s2379_s16  ;;  %v1315_v25 = vrot.slane %v3050_v30, %v2583_v4  ;;  %v1825_v7 = vmul.f32 %v3016_v50, %v2695_v10  ;;  %v1182_v50 = vmul.f32 %v1179_v63, %v3048_v22 }
 0x347   :  { %v1318_v17 = vmul.f32 %v1315_v25, %v3048_v22 }
 0x349   :  { %v2356_v38 = vpop.permute.xlu1 %2355  ;;  %1830 = vrot.lane.b32.xlu0 %v1824_v54, %s2379_s16  ;;  %1706 = vrot.lane.b32.xlu1 %v1698_v14, %s2379_s16  ;;  %v1180_v54 = vmul.f32 %v1171_v11, %v3048_v22  ;;  %v1316_v14 = vmul.f32 %v1307_v62, %v3048_v22 }
 0x34a   :  { %v2358_v32 = vunpack.i.h.bf16 %v2356_v38  ;;  %v2357_v56 = vunpack.i.l.bf16 %v2356_v38 }
 0x34c   :  { %v3138_v21 = vmul.f32 0.0, %v2358_v32  ;;  %v1405_v38 = vsel %vm1404_vm7, %v2357_v56, %v2358_v32  ;;  %v3142_v10 = vmul.f32 %v2357_v56, %v2478_v33 }
 0x34d   :  { %v3146_v20 = vmul.f32 %v1405_v38, %v2494_v37  ;;  %v3148_v11 = vpop.permute.xlu1 %1479  ;;  %1834 = vrot.lane.b32.xlu0 %v1826_v2, %s2379_s16  ;;  %1832 = vrot.lane.b32.xlu1 %v1825_v7, %s2379_s16 }
 0x34e   :  { %v1419_v32 = vrot.slane %v3142_v10, %v2471_v31  ;;  %v1441_v33 = vrot.slane %v3142_v10, %v2489_v36  ;;  %v1463_v37 = vrot.slane %v3142_v10, %v2509_v43  ;;  %v1485_v62 = vrot.slane %v3142_v10, %v2533_v51 }
 0x34f   :  { %v1423_v63 = vrot.slane %v3146_v20, %v2471_v31  ;;  %v1427_v56 = vrot.slane %v3138_v21, %v2471_v31  ;;  %v1445_v23 = vrot.slane %v3146_v20, %v2489_v36  ;;  %v1449_v22 = vrot.slane %v3138_v21, %v2489_v36 }
 0x350   :  { %v1450_v7 = vmul.f32 %v1441_v33, %v3093_v12  ;;  %v1494_v2 = vmul.f32 %v1485_v62, %v3148_v11  ;;  %v1428_v25 = vmul.f32 %v1419_v32, %v3091_v0  ;;  %v1472_v38 = vmul.f32 %v1463_v37, %v3128_v29 }
 0x351   :  { %v1595_v16 = vpop.permute.xlu1 %1594  ;;  %1188 = vrot.lane.b32.xlu0 %v1181_v40, %s2382_s21  ;;  %1186 = vrot.lane.b32.xlu1 %v1180_v54, %s2382_s21  ;;  %v1451_v1 = vmul.f32 %v1445_v23, %v3093_v12  ;;  %v1452_v3 = vmul.f32 %v1449_v22, %v3093_v12  ;;  %v1467_v33 = vrot.slane %v3146_v20, %v2509_v43 }
 0x352   :  { %v1453_v55 = vadd.f32 %v1450_v7, %v1428_v25  ;;  %v1600_v62 = vsel %vm274_vm8, %v1595_v16, %v1597_v35  ;;  %v1471_v32 = vrot.slane %v3138_v21, %v2509_v43  ;;  %v1489_v37 = vrot.slane %v3146_v20, %v2533_v51 }
 0x353   :  { %v1493_v40 = vrot.slane %v3138_v21, %v2533_v51  ;;  %v1429_v54 = vmul.f32 %v1423_v63, %v3091_v0  ;;  %v1430_v23 = vmul.f32 %v1427_v56, %v3091_v0  ;;  %v1473_v22 = vmul.f32 %v1467_v33, %v3128_v29 }
 0x354   :  { %v1475_v13 = vadd.f32 %v1472_v38, %v1453_v55  ;;  %v1495_v7 = vmul.f32 %v1489_v37, %v3148_v11  ;;  %v1474_v16 = vmul.f32 %v1471_v32, %v3128_v29  ;;  %v1503_v25 = vrot.slane %v3142_v10, %v2552_v57 }
 0x355   :  { %v1496_v52 = vmul.f32 %v1493_v40, %v3148_v11  ;;  %v1599_v24 = vpop.permute.xlu1 %1598  ;;  %v1454_v42 = vadd.f32 %v1451_v1, %v1429_v54  ;;  %v1455_v60 = vadd.f32 %v1452_v3, %v1430_v23  ;;  %1322 = vrot.lane.b32.xlu0 %v1316_v14, %s2382_s21  ;;  %1190 = vrot.lane.b32.xlu1 %v1182_v50, %s2382_s21  ;;  %v1735_v3 = vpop.permute.xlu0 %1734 }
 0x356   :  { %v1497_v63 = vadd.f32 %v1494_v2, %v1475_v13  ;;  %v1601_v56 = vsel %vm274_vm8, %v1597_v35, %v1599_v24  ;;  %v1507_v55 = vrot.slane %v3146_v20, %v2552_v57  ;;  %v1521_v38 = vrot.slane %v3142_v10, %v2583_v4 }
 0x357   :  { %v1476_v33 = vadd.f32 %v1473_v22, %v1454_v42  ;;  %v1477_v32 = vadd.f32 %v1474_v16, %v1455_v60  ;;  %v1525_v37 = vrot.slane %v3146_v20, %v2583_v4  ;;  %v1539_v1 = vrot.slane %v3142_v10, %v2599_v9 }
 0x358   :  { %v3206_v14 = vadd.f32 %v1600_v62, %v1497_v63  ;;  %v1530_v13 = vmul.f32 %v1521_v38, %v3093_v12  ;;  %v1543_v35 = vrot.slane %v3146_v20, %v2599_v9  ;;  %v1557_v50 = vrot.slane %v3142_v10, %v2633_v26 }
 0x359   :  { %v1498_v2 = vadd.f32 %v1495_v7, %v1476_v33  ;;  %v1499_v42 = vadd.f32 %v1496_v52, %v1477_v32  ;;  %v1531_v60 = vmul.f32 %v1525_v37, %v3093_v12  ;;  %v1561_v40 = vrot.slane %v3146_v20, %v2633_v26  ;;  %1326 = vrot.lane.b32.xlu0 %v1318_v17, %s2382_s21  ;;  %v3242_v33 = vpop.permute.xlu0 %1738 }
 0x35a   :  { %v1566_v62 = vmul.f32 %v1557_v50, %v3148_v11  ;;  %v1512_v54 = vmul.f32 %v1503_v25, %v3091_v0  ;;  %v1513_v23 = vmul.f32 %v1507_v55, %v3091_v0  ;;  %v1548_v22 = vmul.f32 %v1539_v1, %v3128_v29  ;;  %1324 = vrot.lane.b32.xlu1 %v1317_v8, %s2382_s21  ;;  %v1737_v55 = vpop.permute.xlu1 %1736 }
 0x35b   :  { %v3222_v10 = vadd.f32 %v1601_v56, %v1498_v2  ;;  %v3224_v52 = vadd.f32 %v1599_v24, %v1499_v42  ;;  %v1567_v7 = vmul.f32 %v1561_v40, %v3148_v11  ;;  %v1549_v20 = vmul.f32 %v1543_v35, %v3128_v29 }
 0x35c   :  { %v1533_v16 = vadd.f32 %v1530_v13, %v1512_v54  ;;  %v1534_v17 = vadd.f32 %v1531_v60, %v1513_v23  ;;  %v2007_v63 = vrot.slane %v3083_v47, %v2552_v57  ;;  %v2011_v25 = vrot.slane %v3089_v45, %v2552_v57 }
 0x35d   :  { %1880 = vrot.lane.b32.xlu0 %v3136_v28, %s2382_s21  ;;  %v1511_v24 = vrot.slane %v3138_v21, %v2552_v57  ;;  %v1529_v8 = vrot.slane %v3138_v21, %v2583_v4  ;;  %v1547_v56 = vrot.slane %v3138_v21, %v2599_v9  ;;  %v1565_v38 = vrot.slane %v3138_v21, %v2633_v26 }
 0x35e   :  { %v1551_v32 = vadd.f32 %v1548_v22, %v1533_v16  ;;  %v1552_v37 = vadd.f32 %v1549_v20, %v1534_v17  ;;  %v1740_v1 = vsel %vm274_vm8, %v1735_v3, %v1737_v55  ;;  %1878 = vrot.lane.b32.xlu1 %v3133_v44, %s2382_s21  ;;  %v4037_v28 = vrot.slane %v3080_v46, %v2552_v57 }
 0x35f   :  { %v1741_v35 = vsel %vm274_vm8, %v1737_v55, %v3242_v33  ;;  %v1514_v50 = vmul.f32 %v1511_v24, %v3091_v0  ;;  %v1532_v21 = vmul.f32 %v1529_v8, %v3093_v12  ;;  %v1550_v2 = vmul.f32 %v1547_v56, %v3128_v29 }
 0x360   :  { %v2012_v13 = vmul.f32 %v4037_v28, %v3028_v41  ;;  %v1569_v42 = vadd.f32 %v1566_v62, %v1551_v32  ;;  %v1570_v60 = vadd.f32 %v1567_v7, %v1552_v37  ;;  %v4038_v44 = vrot.slane %v3089_v45, %v2471_v31 }
 0x361   :  { %v1568_v40 = vmul.f32 %v1565_v38, %v3148_v11  ;;  %v1535_v54 = vadd.f32 %v1532_v21, %v1514_v50  ;;  %v2014_v29 = vmul.f32 %v2011_v25, %v3028_v41  ;;  %v1211_v0 = vrot.slane %v3034_v18, %v2509_v43 }
 0x362   :  { %v1874_v3 = vmul.f32 %v4038_v44, %v3028_v41  ;;  %2018 = vrot.lane.b32.xlu0 %v2012_v13, %s2382_s21  ;;  %v3262_v23 = vadd.f32 %v1740_v1, %v1569_v42  ;;  %v3264_v22 = vadd.f32 %v1741_v35, %v1570_v60  ;;  %v2013_v62 = vmul.f32 %v2007_v63, %v3028_v41 }
 0x363   :  { %v1553_v12 = vadd.f32 %v1550_v2, %v1535_v54  ;;  %v1207_v11 = vrot.slane %v3031_v53, %v2509_v43  ;;  %v1217_v20 = vmul.f32 %v1211_v0, %v3042_v48  ;;  %v1339_v16 = vrot.slane %v3031_v53, %v2599_v9 }
 0x364   :  { %1882 = vrot.lane.b32.xlu1 %v1874_v3, %s2382_s21  ;;  %v1215_v25 = vrot.slane %v3050_v30, %v2509_v43  ;;  %v1347_v63 = vrot.slane %v3050_v30, %v2599_v9  ;;  %v1343_v24 = vrot.slane %v3034_v18, %v2599_v9  ;;  %v1903_v56 = vrot.slane %v3083_v47, %v2489_v36 }
 0x365   :  { %v3274_v7 = vadd.f32 %v1568_v40, %v1553_v12  ;;  %v1216_v17 = vmul.f32 %v1207_v11, %v3042_v48  ;;  %v1348_v41 = vmul.f32 %v1339_v16, %v3042_v48  ;;  %v1899_v32 = vrot.slane %v3080_v46, %v2489_v36  ;;  %v3343_v11 = vld [vmem:[%s3920_s0] sm:$0xff] }
 0x366   :  { %2022 = vrot.lane.b32.xlu0 %v2014_v29, %s2382_s21  ;;  %v1218_v55 = vmul.f32 %v1215_v25, %v3042_v48  ;;  %v1350_v8 = vmul.f32 %v1347_v63, %v3042_v48  ;;  %v1349_v38 = vmul.f32 %v1343_v24, %v3042_v48  ;;  %v1909_v37 = vmul.f32 %v1903_v56, %v3056_v6 }
 0x367   :  { %v2035_v1 = vrot.slane %v3080_v46, %v2583_v4  ;;  %v1908_v28 = vmul.f32 %v1899_v32, %v3056_v6  ;;  %v1907_v13 = vrot.slane %v3089_v45, %v2489_v36  ;;  %v2043_v35 = vrot.slane %v3089_v45, %v2583_v4 }
 0x368   :  { %2020 = vrot.lane.b32.xlu1 %v2013_v62, %s2382_s21  ;;  %v2039_v21 = vrot.slane %v3083_v47, %v2583_v4  ;;  %v2320_v2 = vunpack.i.l.bf16 %v2796_v27  ;;  %v1247_v60 = vrot.slane %v3034_v18, %v2533_v51  ;;  %v2321_v44 = vunpack.i.h.bf16 %v2796_v27 }
 0x369   :  { %v2044_v48 = vmul.f32 %v2035_v1, %v3056_v6  ;;  %v1910_v50 = vmul.f32 %v1907_v13, %v3056_v6  ;;  %v2046_v42 = vmul.f32 %v2043_v35, %v3056_v6  ;;  %v1243_v40 = vrot.slane %v3031_v53, %v2533_v51  ;;  %v3381_v35 = vpop.permute.xlu0 %1089 }
 0x36a   :  { %1224 = vrot.lane.b32.xlu0 %v1217_v20, %s2382_s21  ;;  %v2045_v3 = vmul.f32 %v2039_v21, %v3056_v6  ;;  %v3327_v54 = vmul.f32 0.0, %v2320_v2  ;;  %v1253_v29 = vmul.f32 %v1247_v60, %v3073_v59  ;;  %v1371_v0 = vrot.slane %v3031_v53, %v2633_v26 }
 0x36b   :  { %v810_v12 = vsel %vm274_vm8, %v2320_v2, %v2321_v44  ;;  %v1252_v6 = vmul.f32 %v1243_v40, %v3073_v59  ;;  %v1251_v62 = vrot.slane %v3050_v30, %v2533_v51  ;;  %v1939_v56 = vrot.slane %v3083_v47, %v2509_v43 }
 0x36c   :  { %1222 = vrot.lane.b32.xlu1 %v1216_v17, %s2382_s21  ;;  %v3346_v53 = vmul.f32 %v3343_v11, %v810_v12  ;;  %v908_v20 = vrot.slane %v3327_v54, %v2552_v57  ;;  %v1380_v16 = vmul.f32 %v1371_v0, %v3073_v59  ;;  %v1379_v17 = vrot.slane %v3050_v30, %v2633_v26 }
 0x36d   :  { %v1254_v25 = vmul.f32 %v1251_v62, %v3073_v59  ;;  %v962_v13 = vrot.slane %v3327_v54, %v2633_v26  ;;  %v1945_v21 = vmul.f32 %v1939_v56, %v3064_v19  ;;  %v2067_v2 = vrot.slane %v3080_v46, %v2599_v9 }
 0x36e   :  { %1354 = vrot.lane.b32.xlu0 %v1348_v41, %s2382_s21  ;;  %v1375_v41 = vrot.slane %v3034_v18, %v2633_v26  ;;  %v917_v63 = vmul.f32 %v908_v20, %v2934_v39  ;;  %v1382_v30 = vmul.f32 %v1379_v17, %v3073_v59  ;;  %v1943_v60 = vrot.slane %v3089_v45, %v2509_v43 }
 0x36f   :  { %v971_v40 = vmul.f32 %v962_v13, %v2936_v15  ;;  %v948_v0 = vrot.slane %v3346_v53, %v2599_v9  ;;  %v2075_v17 = vrot.slane %v3089_v45, %v2599_v9  ;;  %v2107_v27 = vrot.slane %v3089_v45, %v2633_v26 }
 0x370   :  { %1226 = vrot.lane.b32.xlu1 %v1218_v55, %s2382_s21  ;;  %v926_v55 = vrot.slane %v3327_v54, %v2583_v4  ;;  %v1381_v18 = vmul.f32 %v1375_v41, %v3073_v59  ;;  %v1946_v41 = vmul.f32 %v1943_v60, %v3064_v19 }
 0x371   :  { %v954_v12 = vmul.f32 %v948_v0, %v2843_v58 }
 0x372   :  { %1358 = vrot.lane.b32.xlu0 %v1350_v8, %s2382_s21  ;;  %v935_v24 = vmul.f32 %v926_v55, %v2841_v5  ;;  %v912_v8 = vrot.slane %v3346_v53, %v2552_v57 }
 0x374   :  { %1356 = vrot.lane.b32.xlu1 %v1349_v38, %s2382_s21  ;;  %v1935_v38 = vrot.slane %v3080_v46, %v2509_v43  ;;  %v938_v32 = vadd.f32 %v935_v24, %v917_v63  ;;  %v918_v1 = vmul.f32 %v912_v8, %v2934_v39  ;;  %v2071_v63 = vrot.slane %v3083_v47, %v2599_v9 }
 0x376   :  { %1916 = vrot.lane.b32.xlu0 %v1909_v37, %s2382_s21  ;;  %v944_v37 = vrot.slane %v3327_v54, %v2599_v9 }
 0x378   :  { %1914 = vrot.lane.b32.xlu1 %v1908_v28, %s2382_s21  ;;  %v930_v28 = vrot.slane %v3346_v53, %v2583_v4  ;;  %v953_v59 = vmul.f32 %v944_v37, %v2843_v58  ;;  %v1971_v37 = vrot.slane %v3080_v46, %v2533_v51 }
 0x37a   :  { %2050 = vrot.lane.b32.xlu0 %v2044_v48, %s2382_s21  ;;  %v936_v48 = vmul.f32 %v930_v28, %v2841_v5 }
 0x37c   :  { %1918 = vrot.lane.b32.xlu1 %v1910_v50, %s2382_s21  ;;  %v1088_v50 = vpop.permute.xlu1 %1087 }
 0x37e   :  { %2054 = vrot.lane.b32.xlu0 %v2046_v42, %s2382_s21  ;;  %v1944_v42 = vmul.f32 %v1935_v38, %v3064_v19 }
 0x380   :  { %2052 = vrot.lane.b32.xlu1 %v2045_v3, %s2382_s21  ;;  %v956_v3 = vadd.f32 %v953_v59, %v938_v32  ;;  %v2078_v32 = vmul.f32 %v2075_v17, %v3064_v19  ;;  %v2077_v59 = vmul.f32 %v2071_v63, %v3064_v19 }
 0x382   :  { %1260 = vrot.lane.b32.xlu0 %v1253_v29, %s2382_s21  ;;  %v939_v29 = vadd.f32 %v936_v48, %v918_v1  ;;  %v974_v55 = vadd.f32 %v971_v40, %v956_v3  ;;  %v1975_v1 = vrot.slane %v3083_v47, %v2533_v51 }
 0x384   :  { %1258 = vrot.lane.b32.xlu1 %v1252_v6, %s2382_s21  ;;  %v966_v6 = vrot.slane %v3346_v53, %v2633_v26  ;;  %v957_v24 = vadd.f32 %v954_v12, %v939_v29  ;;  %v1065_v56 = vadd.f32 %v2950_v49, %v974_v55  ;;  %v2099_v12 = vrot.slane %v3080_v46, %v2633_v26 }
 0x386   :  { %1386 = vrot.lane.b32.xlu0 %v1380_v16, %s2382_s21  ;;  %v2076_v16 = vmul.f32 %v2067_v2, %v3064_v19  ;;  %v972_v8 = vmul.f32 %v966_v6, %v2936_v15  ;;  %v1080_v2 = vadd.f32 %v2953_v61, %v1065_v56 }
 0x388   :  { %1262 = vrot.lane.b32.xlu1 %v1254_v25, %s2382_s21  ;;  %v975_v48 = vadd.f32 %v972_v8, %v957_v24 }
 0x38a   :  { %1390 = vrot.lane.b32.xlu0 %v1382_v30, %s2382_s21 }
 0x38c   :  { %1388 = vrot.lane.b32.xlu1 %v1381_v18, %s2382_s21 }
 0x38e   :  { %1952 = vrot.lane.b32.xlu0 %v1945_v21, %s2382_s21 }
 0x38f   :  { %v1631_v62 = vpop.permute.xlu1 %1630  ;;  %v1633_v20 = vpop.permute.xlu0 %1632 }
 0x390   :  { %1950 = vrot.lane.b32.xlu1 %v1944_v42, %s2382_s21  ;;  %v1636_v25 = vsel %vm274_vm8, %v1631_v62, %v1633_v20  ;;  %v4039_v42 = vld [vmem:[#allocation66_spill] sm:$0xff]  ;;  %v3442_v62 = vld [vmem:[%s3920_s0 + $0x8] sm:$0xff]  ;;  %s2408_s0 = smov 112  }
 0x391   :  { %v1641_v30 = vadd.f32 %v1636_v25, %v3206_v14  ;;  %v1061_v14 = vsel %vm274_vm8, %v2950_v49, %v3002_v34  ;;  %v1076_v60 = vsel %vm274_vm8, %v2953_v61, %v4039_v42  ;;  %v1747_v49 = vadd.f32 %v3242_v33, %v3274_v7 }
 0x392   :  { %2082 = vrot.lane.b32.xlu0 %v2076_v16, %s2382_s21  ;;  %v1066_v19 = vadd.f32 %v1061_v14, %v975_v48  ;;  %v1091_v61 = vsel %vm274_vm8, %v1088_v50, %v3381_v35  ;;  %v1095_v25 = vadd.f32 %v1088_v50, %v1080_v2 }
 0x393   :  { %v1635_v18 = vpop.permute.xlu1 %1634  ;;  %v1767_v38 = vpop.permute.xlu0 %1766 }
 0x394   :  { %1954 = vrot.lane.b32.xlu1 %v1946_v41, %s2382_s21  ;;  %v1637_v28 = vsel %vm274_vm8, %v1633_v20, %v1635_v18  ;;  %v1643_v13 = vadd.f32 %v1635_v18, %v3224_v52  ;;  %v1979_v52 = vrot.slane %v3089_v45, %v2533_v51  ;;  %v3447_v20 = vmul.f32 %v3442_v62, %v2321_v44 }
 0x395   :  { %v1642_v21 = vadd.f32 %v1637_v28, %v3222_v10  ;;  %v4040_v10 = vld [vmem:[#allocation67_spill] sm:$0xff]  ;;  %v1081_v16 = vadd.f32 %v1076_v60, %v1066_v19 }
 0x396   :  { %2086 = vrot.lane.b32.xlu0 %v2078_v32, %s2382_s21  ;;  %v1980_v29 = vmul.f32 %v1971_v37, %v4040_v10  ;;  %v1981_v0 = vmul.f32 %v1975_v1, %v4040_v10  ;;  %v2108_v24 = vmul.f32 %v2099_v12, %v4040_v10  ;;  %v916_v50 = vrot.slane %v3447_v20, %v2552_v57 }
 0x397   :  { %v1769_v3 = vpop.permute.xlu1 %1768  ;;  %v1771_v40 = vpop.permute.xlu0 %1770  ;;  %v1096_v41 = vadd.f32 %v1091_v61, %v1081_v16  ;;  %v934_v45 = vrot.slane %v3447_v20, %v2583_v4  ;;  %v2110_v37 = vmul.f32 %v2107_v27, %v4040_v10  ;;  %v952_v48 = vrot.slane %v3447_v20, %v2599_v9 }
 0x398   :  { %2084 = vrot.lane.b32.xlu1 %v2077_v59, %s2382_s21  ;;  %v1772_v6 = vsel %vm274_vm8, %v1767_v38, %v1769_v3  ;;  %v1773_v33 = vsel %vm274_vm8, %v1769_v3, %v1771_v40  ;;  %v1779_v7 = vadd.f32 %v1771_v40, %v1747_v49  ;;  %v919_v18 = vmul.f32 %v916_v50, %v2934_v39 }
 0x399   :  { %v1777_v46 = vadd.f32 %v1772_v6, %v3262_v23  ;;  %v1778_v17 = vadd.f32 %v1773_v33, %v3264_v22  ;;  %v1982_v23 = vmul.f32 %v1979_v52, %v4040_v10  ;;  %v2103_v22 = vrot.slane %v3083_v47, %v2633_v26 }
 0x39a   :  { %1988 = vrot.lane.b32.xlu0 %v1981_v0, %s2382_s21  ;;  %v937_v14 = vmul.f32 %v934_v45, %v2841_v5  ;;  %v955_v19 = vmul.f32 %v952_v48, %v2843_v58  ;;  %v970_v3 = vrot.slane %v3447_v20, %v2633_v26 }
 0x39b   :  { %v1103_v63 = vpop.permute.xlu1 %1102  ;;  %v1105_v55 = vpop.permute.xlu0 %1104  ;;  %v2109_v47 = vmul.f32 %v2103_v22, %v4040_v10 }
 0x39c   :  { %1986 = vrot.lane.b32.xlu1 %v1980_v29, %s2382_s21  ;;  %v1110_v44 = vadd.f32 %v1103_v63, %v1095_v25  ;;  %v1106_v8 = vsel %vm274_vm8, %v1103_v63, %v1105_v55  ;;  %v940_v59 = vadd.f32 %v937_v14, %v919_v18  ;;  %v973_v10 = vmul.f32 %v970_v3, %v2936_v15 }
 0x39d   :  { %v1111_v56 = vadd.f32 %v1106_v8, %v1096_v41 }
 0x39e   :  { %2114 = vrot.lane.b32.xlu0 %v2108_v24, %s2382_s21 }
 0x39f   :  { %v1667_v38 = vpop.permute.xlu1 %1666  ;;  %v1669_v32 = vpop.permute.xlu0 %1668 }
 0x3a0   :  { %1990 = vrot.lane.b32.xlu1 %v1982_v23, %s2382_s21  ;;  %v1672_v1 = vsel %vm274_vm8, %v1667_v38, %v1669_v32 }
 0x3a1   :  { %v1677_v28 = vadd.f32 %v1672_v1, %v1641_v30  ;;  %v958_v30 = vadd.f32 %v955_v19, %v940_v59 }
 0x3a2   :  { %2118 = vrot.lane.b32.xlu0 %v2110_v37, %s2382_s21 }
 0x3a3   :  { %v1671_v2 = vpop.permute.xlu1 %1670  ;;  %v1799_v60 = vpop.permute.xlu0 %1798 }
 0x3a4   :  { %2116 = vrot.lane.b32.xlu1 %v2109_v47, %s2382_s21  ;;  %v1673_v49 = vsel %vm274_vm8, %v1669_v32, %v1671_v2  ;;  %v1679_v52 = vadd.f32 %v1671_v2, %v1643_v13  ;;  %v976_v13 = vadd.f32 %v973_v10, %v958_v30 }
 0x3a5   :  { %v1678_v40 = vadd.f32 %v1673_v49, %v1642_v21 }
 0x3a6   :  { %v1067_v63 = vadd.f32 %v3002_v34, %v976_v13 }
 0x3a7   :  { %v1801_v29 = vpop.permute.xlu1 %1800  ;;  %v1803_v0 = vpop.permute.xlu0 %1802 }
 0x3a8   :  { %v1804_v12 = vsel %vm274_vm8, %v1799_v60, %v1801_v29  ;;  %v1805_v61 = vsel %vm274_vm8, %v1801_v29, %v1803_v0  ;;  %v1811_v6 = vadd.f32 %v1803_v0, %v1779_v7  ;;  %v1082_v24 = vadd.f32 %v4039_v42, %v1067_v63 }
 0x3a9   :  { %v1809_v33 = vadd.f32 %v1804_v12, %v1777_v46  ;;  %v1810_v16 = vadd.f32 %v1805_v61, %v1778_v17  ;;  %v846_v63 = vrot.slane %v3327_v54, %v2489_v36 }
 0x3aa   :  { %v1097_v46 = vadd.f32 %v3381_v35, %v1082_v24 }
 0x3ab   :  { %v3482_v25 = vpop.permute.xlu1 %1150  ;;  %v1153_v41 = vpop.permute.xlu0 %1152 }
 0x3ac   :  { %v3486_v21 = vsel %vm561_vm9, %v3482_v25, %v1153_v41  ;;  %v1112_v17 = vadd.f32 %v1105_v55, %v1097_v46 }
 0x3af   :  { %v1155_v27 = vpop.permute.xlu1 %1154  ;;  %v1291_v8 = vpop.permute.xlu0 %1290 }
 0x3b0   :  { %v3491_v23 = vsel %vm561_vm9, %v1153_v41, %v1155_v27  ;;  %v3493_v7 = vadd.f32 %v1291_v8, %v1110_v44  ;;  %v850_v27 = vrot.slane %v3346_v53, %v2489_v36 }
 0x3b3   :  { %v1293_v22 = vpop.permute.xlu1 %1292  ;;  %v1295_v50 = vpop.permute.xlu0 %1294 }
 0x3b4   :  { %v1296_v18 = vsel %vm561_vm9, %v1291_v8, %v1293_v22  ;;  %v1297_v45 = vsel %vm561_vm9, %v1293_v22, %v1295_v50  ;;  %v855_v8 = vmul.f32 %v846_v63, %v2841_v5  ;;  %v856_v22 = vmul.f32 %v850_v27, %v2841_v5 }
 0x3b5   :  { %v3498_v38 = vadd.f32 %v1296_v18, %v1111_v56  ;;  %v3500_v34 = vadd.f32 %v1297_v45, %v1112_v17  ;;  %v832_v17 = vrot.slane %v3447_v20, %v2471_v31  ;;  %v868_v45 = vrot.slane %v3327_v54, %v2509_v43 }
 0x3b6   :  { %v876_v63 = vrot.slane %v3447_v20, %v2509_v43 }
 0x3b7   :  { %v1703_v42 = vpop.permute.xlu1 %1702  ;;  %v1705_v32 = vpop.permute.xlu0 %1704 }
 0x3b8   :  { %v1708_v37 = vsel %vm274_vm8, %v1703_v42, %v1705_v32  ;;  %v835_v42 = vmul.f32 %v832_v17, %v2934_v39 }
 0x3b9   :  { %v3503_v1 = vadd.f32 %v1708_v37, %v1677_v28 }
 0x3bb   :  { %v1707_v44 = vpop.permute.xlu1 %1706  ;;  %v1831_v47 = vpop.permute.xlu0 %1830 }
 0x3bc   :  { %v1709_v35 = vsel %vm274_vm8, %v1705_v32, %v1707_v44  ;;  %v3506_v55 = vadd.f32 %v1707_v44, %v1679_v52  ;;  %v854_v32 = vrot.slane %v3447_v20, %v2489_v36  ;;  %v872_v44 = vrot.slane %v3346_v53, %v2509_v43 }
 0x3bd   :  { %v3508_v14 = vadd.f32 %v1709_v35, %v1678_v40  ;;  %v890_v35 = vrot.slane %v3327_v54, %v2533_v51 }
 0x3bf   :  { %v1833_v59 = vpop.permute.xlu1 %1832  ;;  %v1835_v48 = vpop.permute.xlu0 %1834 }
 0x3c0   :  { %v1836_v56 = vsel %vm274_vm8, %v1831_v47, %v1833_v59  ;;  %v1837_v2 = vsel %vm274_vm8, %v1833_v59, %v1835_v48  ;;  %v3512_v60 = vadd.f32 %v1835_v48, %v1811_v6  ;;  %v824_v6 = vrot.slane %v3327_v54, %v2471_v31 }
 0x3c1   :  { %v3514_v49 = vadd.f32 %v1836_v56, %v1809_v33  ;;  %v3516_v28 = vadd.f32 %v1837_v2, %v1810_v16  ;;  %v828_v16 = vrot.slane %v3346_v53, %v2471_v31  ;;  %v877_v47 = vmul.f32 %v868_v45, %v2843_v58  ;;  %v4042_v45 = vld [vmem:[#allocation38_spill] sm:$0xff] }
 0x3c2   :  { %v833_v41 = vmul.f32 %v824_v6, %v2934_v39  ;;  %v857_v48 = vmul.f32 %v854_v32, %v2841_v5  ;;  %v878_v56 = vmul.f32 %v872_v44, %v2843_v58  ;;  %v898_v5 = vrot.slane %v3447_v20, %v2533_v51 }
 0x3c3   :  { %v3518_v19 = vpop.permute.xlu1 %1186  ;;  %v3520_v3 = vpop.permute.xlu0 %1188  ;;  %v834_v24 = vmul.f32 %v828_v16, %v2934_v39  ;;  %v894_v39 = vrot.slane %v3346_v53, %v2533_v51  ;;  %v899_v16 = vmul.f32 %v890_v35, %v2936_v15  ;;  %v4041_v53 = vld [vmem:[#allocation59_spill] sm:$0xff]  ;;  %v4044_v35 = vld [vmem:[#allocation60_spill] sm:$0xff] }
 0x3c4   :  { %v858_v18 = vadd.f32 %v855_v8, %v833_v41  ;;  %v860_v41 = vadd.f32 %v857_v48, %v835_v42  ;;  %v879_v8 = vmul.f32 %v876_v63, %v2843_v58  ;;  %v901_v42 = vmul.f32 %v898_v5, %v2936_v15 }
 0x3c5   :  { %v859_v37 = vadd.f32 %v856_v22, %v834_v24  ;;  %v900_v54 = vmul.f32 %v894_v39, %v2936_v15 }
 0x3c6   :  { %v880_v6 = vadd.f32 %v877_v47, %v858_v18  ;;  %v989_v18 = vsel %vm274_vm8, %v4042_v45, %v4041_v53  ;;  %v882_v32 = vadd.f32 %v879_v8, %v860_v41  ;;  %v4043_v47 = vld [vmem:[#allocation61_spill] sm:$0xff]  ;;  %v4048_v8 = vld [vmem:[#allocation64_spill] sm:$0xff] }
 0x3c7   :  { %v3522_v52 = vpop.permute.xlu1 %1190  ;;  %v3524_v40 = vpop.permute.xlu0 %1322  ;;  %v881_v24 = vadd.f32 %v878_v56, %v859_v37  ;;  %v1008_v48 = vsel %vm274_vm8, %v4044_v35, %v4043_v47 }
 0x3c8   :  { %v902_v22 = vadd.f32 %v899_v16, %v880_v6  ;;  %v4045_v6 = vld [vmem:[#allocation63_spill] sm:$0xff]  ;;  %v4046_v16 = vld [vmem:[#allocation62_spill] sm:$0xff]  ;;  %v904_v63 = vadd.f32 %v901_v42, %v882_v32  ;;  %v1192_v42 = vsel %vm561_vm9, %v3518_v19, %v3520_v3 }
 0x3c9   :  { %v903_v44 = vadd.f32 %v900_v54, %v881_v24  ;;  %v1027_v41 = vsel %vm274_vm8, %v4046_v16, %v4045_v6  ;;  %v4047_v54 = vld [vmem:[#allocation65_spill] sm:$0xff] }
 0x3ca   :  { %v993_v37 = vadd.f32 %v4042_v45, %v902_v22  ;;  %v1046_v5 = vsel %vm274_vm8, %v4048_v8, %v4047_v54  ;;  %v995_v45 = vadd.f32 %v4041_v53, %v904_v63  ;;  %v1193_v63 = vsel %vm561_vm9, %v3520_v3, %v3522_v52 }
 0x3cb   :  { %v3526_v30 = vpop.permute.xlu0 %1326  ;;  %v994_v56 = vadd.f32 %v989_v18, %v903_v44 }
 0x3cc   :  { %v3528_v10 = vpop.permute.xlu1 %1324  ;;  %v1012_v39 = vadd.f32 %v4044_v35, %v993_v37  ;;  %v1014_v35 = vadd.f32 %v4043_v47, %v995_v45 }
 0x3cd   :  { %v1013_v15 = vadd.f32 %v1008_v48, %v994_v56  ;;  %v1328_v3 = vsel %vm561_vm9, %v3524_v40, %v3528_v10 }
 0x3ce   :  { %v1031_v24 = vadd.f32 %v4046_v16, %v1012_v39  ;;  %v1033_v56 = vadd.f32 %v4045_v6, %v1014_v35 }
 0x3cf   :  { %v3530_v29 = vpop.permute.xlu0 %1880  ;;  %v1032_v18 = vadd.f32 %v1027_v41, %v1013_v15 }
 0x3d0   :  { %v3532_v0 = vpop.permute.xlu1 %1878  ;;  %v1050_v37 = vadd.f32 %v4048_v8, %v1031_v24  ;;  %v1052_v41 = vadd.f32 %v4047_v54, %v1033_v56 }
 0x3d1   :  { %v1051_v26 = vadd.f32 %v1046_v5, %v1032_v18 }
 0x3d2   :  { %v1161_v32 = vadd.f32 %v3482_v25, %v1050_v37  ;;  %v1163_v6 = vadd.f32 %v3491_v23, %v1052_v41  ;;  %v1329_v23 = vsel %vm561_vm9, %v3528_v10, %v3526_v30 }
 0x3d3   :  { %v1162_v53 = vadd.f32 %v3486_v21, %v1051_v26  ;;  %v1333_v26 = vadd.f32 %v3524_v40, %v3493_v7  ;;  %v1334_v40 = vadd.f32 %v1328_v3, %v3498_v38 }
 0x3d4   :  { %v3534_v12 = vpop.permute.xlu0 %2018  ;;  %v1197_v16 = vadd.f32 %v3518_v19, %v1161_v32  ;;  %v1199_v45 = vadd.f32 %v1193_v63, %v1163_v6 }
 0x3d5   :  { %v1198_v25 = vadd.f32 %v1192_v42, %v1162_v53  ;;  %v1335_v42 = vadd.f32 %v1329_v23, %v3500_v34  ;;  %v1884_v34 = vsel %vm561_vm9, %v3532_v0, %v3530_v29 }
 0x3d6   :  { %v3536_v61 = vpop.permute.xlu1 %1882  ;;  %v1889_v6 = vadd.f32 %v1884_v34, %v3503_v1 }
 0x3d8   :  { %v3540_v33 = vpop.permute.xlu0 %2022 }
 0x3da   :  { %v3544_v13 = vpop.permute.xlu1 %2020 }
 0x3db   :  { %v2024_v1 = vsel %vm561_vm9, %v3534_v12, %v3544_v13 }
 0x3dc   :  { %v3553_v46 = vpop.permute.xlu0 %1224 }
 0x3de   :  { %v1223_v50 = vpop.permute.xlu1 %1222 }
 0x3df   :  { %v1228_v47 = vsel %vm561_vm9, %v1223_v50, %v3553_v46  ;;  %v1233_v15 = vadd.f32 %v1223_v50, %v1197_v16 }
 0x3e0   :  { %v3568_v59 = vpop.permute.xlu0 %1354  ;;  %v1234_v21 = vadd.f32 %v1228_v47, %v1198_v25 }
 0x3e1   :  { %v1365_v18 = vadd.f32 %v3568_v59, %v1333_v26 }
 0x3e2   :  { %v1227_v2 = vpop.permute.xlu1 %1226 }
 0x3e3   :  { %v1229_v19 = vsel %vm561_vm9, %v3553_v46, %v1227_v2 }
 0x3e4   :  { %v1359_v27 = vpop.permute.xlu0 %1358  ;;  %v1235_v52 = vadd.f32 %v1229_v19, %v1199_v45 }
 0x3e6   :  { %v1357_v17 = vpop.permute.xlu1 %1356 }
 0x3e7   :  { %v1360_v2 = vsel %vm561_vm9, %v3568_v59, %v1357_v17  ;;  %v1361_v35 = vsel %vm561_vm9, %v1357_v17, %v1359_v27 }
 0x3e8   :  { %v3589_v58 = vpop.permute.xlu0 %1916  ;;  %v1366_v10 = vadd.f32 %v1360_v2, %v1334_v40  ;;  %v1367_v53 = vadd.f32 %v1361_v35, %v1335_v42 }
 0x3ea   :  { %v3591_v20 = vpop.permute.xlu1 %1914 }
 0x3ec   :  { %v3601_v22 = vpop.permute.xlu0 %2050 }
 0x3ee   :  { %v3604_v44 = vpop.permute.xlu1 %1918 }
 0x3ef   :  { %v1921_v0 = vsel %vm561_vm9, %v3589_v58, %v3604_v44 }
 0x3f0   :  { %v3612_v48 = vpop.permute.xlu0 %2054 }
 0x3f2   :  { %v3616_v39 = vpop.permute.xlu1 %2052 }
 0x3f3   :  { %v2057_v12 = vsel %vm561_vm9, %v3616_v39, %v3612_v48 }
 0x3f4   :  { %v1261_v24 = vpop.permute.xlu0 %1260 }
 0x3f6   :  { %v1259_v8 = vpop.permute.xlu1 %1258 }
 0x3f7   :  { %v1269_v5 = vadd.f32 %v1259_v8, %v1233_v15  ;;  %v1264_v54 = vsel %vm561_vm9, %v1259_v8, %v1261_v24  ;;  %v1920_v15 = vsel %vm561_vm9, %v3591_v20, %v3589_v58 }
 0x3f8   :  { %v1270_v37 = vadd.f32 %v1264_v54, %v1234_v21  ;;  %v1387_v7 = vpop.permute.xlu0 %1386  ;;  %v1885_v21 = vsel %vm561_vm9, %v3530_v29, %v3536_v61  ;;  %v1925_v19 = vadd.f32 %v1920_v15, %v1889_v6  ;;  %v2025_v29 = vsel %vm561_vm9, %v3544_v13, %v3540_v33 }
 0x3f9   :  { %2134 = vrot.lane.b32.xlu1 %v1269_v5, %s2408_s0  ;;  %v1397_v50 = vadd.f32 %v1387_v7, %v1365_v18  ;;  %v1891_v5 = vadd.f32 %v3536_v61, %v3506_v55  ;;  %v1890_v20 = vadd.f32 %v1885_v21, %v3508_v14  ;;  %v2056_v14 = vsel %vm561_vm9, %v3601_v22, %v3616_v39  ;;  %v4050_v21 = vld [vmem:[#allocation3_spill] sm:$0xff] }
 0x3fa   :  { %v1263_v46 = vpop.permute.xlu1 %1262  ;;  %2136 = vrot.lane.b32.xlu0 %v1270_v37, %s2408_s0  ;;  %v2029_v13 = vadd.f32 %v2024_v1, %v3514_v49  ;;  %v2031_v49 = vadd.f32 %v3540_v33, %v3512_v60 }
 0x3fb   :  { %v1265_v32 = vsel %vm561_vm9, %v1261_v24, %v1263_v46  ;;  %v1927_v37 = vadd.f32 %v3604_v44, %v1891_v5  ;;  %v1926_v58 = vadd.f32 %v1921_v0, %v1890_v20  ;;  %v2030_v44 = vadd.f32 %v2025_v29, %v3516_v28 }
 0x3fc   :  { %v1271_v56 = vadd.f32 %v1265_v32, %v1235_v52  ;;  %v1391_v30 = vpop.permute.xlu0 %1390  ;;  %v2061_v32 = vadd.f32 %v2056_v14, %v2029_v13 }
 0x3fd   :  { %v2062_v40 = vadd.f32 %v2057_v12, %v2030_v44 }
 0x3fe   :  { %v1389_v16 = vpop.permute.xlu1 %1388  ;;  %2138 = vrot.lane.b32.xlu1 %v1271_v56, %s2408_s0  ;;  %2191 = vrot.lane.b32.xlu0 %v1397_v50, %s2408_s0 }
 0x3ff   :  { %v1392_v47 = vsel %vm561_vm9, %v1387_v7, %v1389_v16  ;;  %v1393_v41 = vsel %vm561_vm9, %v1389_v16, %v1391_v30  ;;  %v2063_v16 = vadd.f32 %v3612_v48, %v2031_v49  ;;  %v4053_v49 = vld [vmem:[#allocation5_spill] sm:$0xff] }
 0x400   :  { %v1398_v59 = vadd.f32 %v1392_v47, %v1366_v10  ;;  %v1399_v25 = vadd.f32 %v1393_v41, %v1367_v53  ;;  %v1953_v27 = vpop.permute.xlu0 %1952 }
 0x402   :  { %v1951_v17 = vpop.permute.xlu1 %1950  ;;  %2193 = vrot.lane.b32.xlu1 %v1398_v59, %s2408_s0  ;;  %2195 = vrot.lane.b32.xlu0 %v1399_v25, %s2408_s0 }
 0x403   :  { %v1956_v8 = vsel %vm561_vm9, %v1951_v17, %v1953_v27 }
 0x404   :  { %v2083_v38 = vpop.permute.xlu0 %2082  ;;  %v1961_v45 = vadd.f32 %v1956_v8, %v1925_v19  ;;  %v4051_v19 = vld [vmem:[#allocation4_spill] sm:$0xff] }
 0x406   :  { %v1955_v63 = vpop.permute.xlu1 %1954 }
 0x407   :  { %v1957_v55 = vsel %vm561_vm9, %v1953_v27, %v1955_v63  ;;  %v1963_v23 = vadd.f32 %v1955_v63, %v1927_v37  ;;  %v4049_v27 = vld [vmem:[#allocation7_spill] sm:$0xff] }
 0x408   :  { %v2087_v24 = vpop.permute.xlu0 %2086  ;;  %v1962_v52 = vadd.f32 %v1957_v55, %v1926_v58  ;;  %v2301_v60 = vunpack.i.h.bf16 %v4049_v27  ;;  %v2300_v33 = vunpack.i.l.bf16 %v4049_v27 }
 0x409   :  { %v2095_v59 = vadd.f32 %v2087_v24, %v2063_v16 }
 0x40a   :  { %v2085_v26 = vpop.permute.xlu1 %2084  ;;  %v78_v17 = vsel %vm77_vm10, %v2300_v33, %v2301_v60  ;;  %v3696_v48 = vmul.f32 %v3442_v62, %v2301_v60 }
 0x40b   :  { %v2088_v50 = vsel %vm561_vm9, %v2083_v38, %v2085_v26  ;;  %v2089_v2 = vsel %vm561_vm9, %v2085_v26, %v2087_v24  ;;  %v3690_v38 = vmul.f32 0.0, %v2300_v33  ;;  %v3693_v63 = vmul.f32 %v3343_v11, %v78_v17 }
 0x40c   :  { %v1989_v54 = vpop.permute.xlu0 %1988  ;;  %v2093_v56 = vadd.f32 %v2088_v50, %v2061_v32  ;;  %v2094_v28 = vadd.f32 %v2089_v2, %v2062_v40  ;;  %v101_v11 = vrot.slane %v3696_v48, %v2471_v31  ;;  %v123_v62 = vrot.slane %v3696_v48, %v2489_v36 }
 0x40d   :  { %v93_v34 = vrot.slane %v3690_v38, %v2471_v31  ;;  %v115_v15 = vrot.slane %v3690_v38, %v2489_v36  ;;  %v97_v24 = vrot.slane %v3693_v63, %v2471_v31  ;;  %v119_v6 = vrot.slane %v3693_v63, %v2489_v36 }
 0x40e   :  { %v1987_v18 = vpop.permute.xlu1 %1986  ;;  %v137_v26 = vrot.slane %v3690_v38, %v2509_v43  ;;  %v141_v20 = vrot.slane %v3693_v63, %v2509_v43  ;;  %v145_v1 = vrot.slane %v3696_v48, %v2509_v43  ;;  %v185_v31 = vrot.slane %v3696_v48, %v2552_v57 }
 0x40f   :  { %v1992_v61 = vsel %vm561_vm9, %v1987_v18, %v1989_v54  ;;  %v102_v8 = vmul.f32 %v93_v34, %v4050_v21  ;;  %v124_v5 = vmul.f32 %v115_v15, %v4051_v19  ;;  %v103_v0 = vmul.f32 %v97_v24, %v4050_v21 }
 0x410   :  { %v1997_v3 = vadd.f32 %v1992_v61, %v1961_v45  ;;  %v2115_v7 = vpop.permute.xlu0 %2114  ;;  %v159_v36 = vrot.slane %v3690_v38, %v2533_v51  ;;  %v203_v45 = vrot.slane %v3696_v48, %v2583_v4  ;;  %v181_v18 = vrot.slane %v3693_v63, %v2552_v57 }
 0x411   :  { %v199_v29 = vrot.slane %v3693_v63, %v2583_v4  ;;  %v104_v37 = vmul.f32 %v101_v11, %v4050_v21  ;;  %v126_v55 = vmul.f32 %v123_v62, %v4051_v19  ;;  %v177_v43 = vrot.slane %v3690_v38, %v2552_v57  ;;  %v4058_v11 = vld [vmem:[#allocation11_spill] sm:$0xff]  ;;  %v4059_v62 = vld [vmem:[#allocation33_spill] sm:$0xff] }
 0x412   :  { %v1991_v46 = vpop.permute.xlu1 %1990  ;;  %2152 = vrot.lane.b32.xlu1 %v1997_v3, %s2409_s29  ;;  %v195_v61 = vrot.slane %v3690_v38, %v2583_v4  ;;  %v127_v58 = vadd.f32 %v124_v5, %v102_v8  ;;  %v4052_v3 = vld [vmem:[#allocation9_spill] sm:$0xff]  ;;  %v188_v44 = vmul.f32 %v185_v31, %v4050_v21  ;;  %v206_v57 = vmul.f32 %v203_v45, %v4051_v19  ;;  %v4062_v31 = vld [vmem:[#allocation35_spill] sm:$0xff] }
 0x413   :  { %v1993_v22 = vsel %vm561_vm9, %v1989_v54, %v1991_v46  ;;  %v1999_v35 = vadd.f32 %v1991_v46, %v1963_v23  ;;  %v125_v54 = vmul.f32 %v119_v6, %v4051_v19  ;;  %v146_v14 = vmul.f32 %v137_v26, %v4052_v3  ;;  %v4057_v6 = vld [vmem:[#allocation32_spill] sm:$0xff] }
 0x414   :  { %v1998_v39 = vadd.f32 %v1993_v22, %v1962_v52  ;;  %v2119_v42 = vpop.permute.xlu0 %2118  ;;  %v221_v23 = vrot.slane %v3696_v48, %v2599_v9  ;;  %v148_v13 = vmul.f32 %v145_v1, %v4052_v3  ;;  %v213_v52 = vrot.slane %v3690_v38, %v2599_v9  ;;  %v4061_v1 = vld [vmem:[#allocation12_spill] sm:$0xff] }
 0x415   :  { %v2127_v25 = vadd.f32 %v2119_v42, %v2095_v59  ;;  %v128_v12 = vadd.f32 %v125_v54, %v103_v0  ;;  %v187_v4 = vmul.f32 %v181_v18, %v4050_v21  ;;  %v205_v46 = vmul.f32 %v199_v29, %v4051_v19  ;;  %v4055_v59 = vld [vmem:[#allocation10_spill] sm:$0xff] }
 0x416   :  { %v2117_v30 = vpop.permute.xlu1 %2116  ;;  %2154 = vrot.lane.b32.xlu0 %v1998_v39, %s2409_s29  ;;  %2156 = vrot.lane.b32.xlu1 %v1999_v35, %s2409_s29  ;;  %v217_v50 = vrot.slane %v3693_v63, %v2599_v9  ;;  %v129_v2 = vadd.f32 %v126_v55, %v104_v37  ;;  %v167_v22 = vrot.slane %v3696_v48, %v2533_v51 }
 0x417   :  { %v2120_v10 = vsel %vm561_vm9, %v2115_v7, %v2117_v30  ;;  %v2121_v53 = vsel %vm561_vm9, %v2117_v30, %v2119_v42  ;;  %v147_v7 = vmul.f32 %v141_v20, %v4052_v3  ;;  %v186_v35 = vmul.f32 %v177_v43, %v4050_v21  ;;  %v4060_v20 = vld [vmem:[#allocation34_spill] sm:$0xff] }
 0x418   :  { %v2125_v47 = vadd.f32 %v2120_v10, %v2093_v56  ;;  %v2126_v41 = vadd.f32 %v2121_v53, %v2094_v28  ;;  %v204_v32 = vmul.f32 %v195_v61, %v4051_v19  ;;  %v149_v40 = vadd.f32 %v146_v14, %v127_v58  ;;  %v4054_v53 = vld [vmem:[#allocation8_spill] sm:$0xff]  ;;  %v4065_v14 = vld [vmem:[#allocation37_spill] sm:$0xff] }
 0x419   :  { %v163_v39 = vrot.slane %v3693_v63, %v2533_v51  ;;  %v224_v42 = vmul.f32 %v221_v23, %v4052_v3  ;;  %v168_v56 = vmul.f32 %v159_v36, %v4053_v49  ;;  %v150_v28 = vadd.f32 %v147_v7, %v128_v12  ;;  %v4063_v61 = vld [vmem:[#allocation36_spill] sm:$0xff] }
 0x41a   :  { %2208 = vrot.lane.b32.xlu0 %v2125_v47, %s2409_s29  ;;  %2210 = vrot.lane.b32.xlu1 %v2126_v41, %s2409_s29  ;;  %v151_v30 = vadd.f32 %v148_v13, %v129_v2  ;;  %v222_v9 = vmul.f32 %v213_v52, %v4052_v3  ;;  %v209_v10 = vadd.f32 %v206_v57, %v188_v44  ;;  %v4066_v52 = vld [vmem:[#allocation40_spill] sm:$0xff]  ;;  %v4067_v57 = vld [vmem:[#allocation14_spill] sm:$0xff] }
 0x41b   :  { %v239_v16 = vrot.slane %v3696_v48, %v4054_v53  ;;  %v208_v47 = vadd.f32 %v205_v46, %v187_v4  ;;  %v223_v41 = vmul.f32 %v217_v50, %v4052_v3  ;;  %v170_v51 = vmul.f32 %v167_v22, %v4053_v49  ;;  %v4064_v3 = vld [vmem:[#allocation13_spill] sm:$0xff]  ;;  %v4068_v50 = vld [vmem:[#allocation15_spill] sm:$0xff] }
 0x41c   :  { %v207_v60 = vadd.f32 %v204_v32, %v186_v35  ;;  %v231_v33 = vrot.slane %v3690_v38, %v4054_v53  ;;  %v171_v17 = vadd.f32 %v168_v56, %v149_v40  ;;  %v169_v34 = vmul.f32 %v163_v39, %v4053_v49  ;;  %v4069_v35 = vld [vmem:[#allocation21_spill] sm:$0xff]  ;;  %v4070_v32 = vld [vmem:[#allocation20_spill] sm:$0xff]  ;;  %v4071_v56 = vld [vmem:[#allocation39_spill] sm:$0xff] }
 0x41d   :  { %v227_v15 = vadd.f32 %v224_v42, %v209_v10  ;;  %v235_v48 = vrot.slane %v3693_v63, %v4054_v53  ;;  %v173_v24 = vadd.f32 %v170_v51, %v151_v30  ;;  %v276_v26 = vsel %vm274_vm8, %v4055_v59, %v4057_v6  ;;  %v4072_v30 = vld [vmem:[#allocation16_spill] sm:$0xff] }
 0x41e   :  { %2212 = vrot.lane.b32.xlu0 %v2127_v25, %s2409_s29  ;;  %v4056_v25 = vld [vmem:[#allocation31_spill] sm:$0xff]  ;;  %v311_v21 = vsel %vm274_vm8, %v4059_v62, %v4058_v11  ;;  %v225_v8 = vadd.f32 %v222_v9, %v207_v60  ;;  %v172_v5 = vadd.f32 %v169_v34, %v150_v28  ;;  %v242_v38 = vmul.f32 %v239_v16, %v4053_v49  ;;  %v4073_v9 = vld [vmem:[#allocation41_spill] sm:$0xff]  ;;  %v4074_v16 = vld [vmem:[#allocation42_spill] sm:$0xff] }
 0x41f   :  { %v275_v27 = vsel %vm274_vm8, %v4056_v25, %v4055_v59  ;;  %v226_v0 = vadd.f32 %v223_v41, %v208_v47  ;;  %v282_v54 = vadd.f32 %v4057_v6, %v173_v24  ;;  %v312_v63 = vsel %vm274_vm8, %v4058_v11, %v4060_v20  ;;  %v4075_v59 = vld [vmem:[#allocation22_spill] sm:$0xff]  ;;  %v4076_v25 = vld [vmem:[#allocation47_spill] sm:$0xff]  ;;  %v4081_v62 = vld [vmem:[#allocation49_spill] sm:$0xff] }
 0x420   :  { %v280_v19 = vadd.f32 %v275_v27, %v171_v17  ;;  %v347_v36 = vsel %vm274_vm8, %v4062_v31, %v4061_v1  ;;  %v240_v45 = vmul.f32 %v231_v33, %v4053_v49  ;;  %v281_v18 = vadd.f32 %v276_v26, %v172_v5  ;;  %v4077_v33 = vld [vmem:[#allocation43_spill] sm:$0xff]  ;;  %v4078_v17 = vld [vmem:[#allocation17_spill] sm:$0xff]  ;;  %v4079_v6 = vld [vmem:[#allocation18_spill] sm:$0xff] }
 0x421   :  { %v245_v37 = vadd.f32 %v242_v38, %v227_v15  ;;  %v241_v55 = vmul.f32 %v235_v48, %v4053_v49  ;;  %v318_v43 = vadd.f32 %v4060_v20, %v282_v54  ;;  %v348_v58 = vsel %vm274_vm8, %v4061_v1, %v4063_v61  ;;  %v4080_v11 = vld [vmem:[#allocation23_spill] sm:$0xff]  ;;  %v4083_v38 = vld [vmem:[#allocation44_spill] sm:$0xff]  ;;  %v4084_v54 = vld [vmem:[#allocation46_spill] sm:$0xff] }
 0x422   :  { %v316_v29 = vadd.f32 %v311_v21, %v280_v19  ;;  %v383_v12 = vsel %vm274_vm8, %v4065_v14, %v4064_v3  ;;  %v243_v23 = vadd.f32 %v240_v45, %v225_v8  ;;  %v317_v7 = vadd.f32 %v312_v63, %v281_v18  ;;  %v4082_v5 = vld [vmem:[#allocation19_spill] sm:$0xff]  ;;  %v4085_v45 = vld [vmem:[#allocation24_spill] sm:$0xff] }
 0x423   :  { %v244_v44 = vadd.f32 %v241_v55, %v226_v0  ;;  %v415_v4 = vsel %vm274_vm8, %v4067_v57, %v4066_v52  ;;  %v354_v46 = vadd.f32 %v4063_v61, %v318_v43  ;;  %v422_v2 = vadd.f32 %v4068_v50, %v245_v37  ;;  %v4086_v18 = vld [vmem:[#allocation51_spill] sm:$0xff]  ;;  %v4087_v43 = vld [vmem:[#allocation45_spill] sm:$0xff]  ;;  %v4091_v57 = vld [vmem:[#allocation50_spill] sm:$0xff] }
 0x424   :  { %v352_v13 = vadd.f32 %v347_v36, %v316_v29  ;;  %v416_v22 = vsel %vm274_vm8, %v4066_v52, %v4068_v50  ;;  %v562_v40 = vsel %vm561_vm9, %v4070_v32, %v4069_v35  ;;  %v353_v42 = vadd.f32 %v348_v58, %v317_v7  ;;  %v4088_v58 = vld [vmem:[#allocation48_spill] sm:$0xff]  ;;  %v4092_v50 = vld [vmem:[#allocation26_spill] sm:$0xff] }
 0x425   :  { %v384_v28 = vsel %vm274_vm8, %v4064_v3, %v4071_v56  ;;  %v447_v10 = vsel %vm274_vm8, %v4073_v9, %v4072_v30  ;;  %v420_v53 = vadd.f32 %v415_v4, %v243_v23  ;;  %v448_v47 = vsel %vm274_vm8, %v4072_v30, %v4074_v16  ;;  %v4095_v30 = vld [vmem:[#allocation52_spill] sm:$0xff] }
 0x426   :  { %v388_v49 = vadd.f32 %v383_v12, %v352_v13  ;;  %v454_v41 = vadd.f32 %v4074_v16, %v422_v2  ;;  %v598_v27 = vsel %vm561_vm9, %v4076_v25, %v4075_v59  ;;  %v390_v51 = vadd.f32 %v4071_v56, %v354_v46  ;;  %v4089_v13 = vld [vmem:[#allocation53_spill] sm:$0xff]  ;;  %v4098_v25 = vld [vmem:[#allocation28_spill] sm:$0xff] }
 0x427   :  { %v421_v60 = vadd.f32 %v416_v22, %v244_v44  ;;  %v479_v34 = vsel %vm274_vm8, %v4078_v17, %v4077_v33  ;;  %v389_v48 = vadd.f32 %v384_v28, %v353_v42  ;;  %v452_v24 = vadd.f32 %v447_v10, %v420_v53  ;;  %v4090_v44 = vld [vmem:[#allocation25_spill] sm:$0xff]  ;;  %v4094_v42 = vld [vmem:[#allocation54_spill] sm:$0xff]  ;;  %v4096_v53 = vld [vmem:[#allocation55_spill] sm:$0xff] }
 0x428   :  { %v567_v15 = vadd.f32 %v562_v40, %v388_v49  ;;  %v480_v26 = vsel %vm274_vm8, %v4077_v33, %v4079_v6  ;;  %v634_v21 = vsel %vm561_vm9, %v4081_v62, %v4080_v11  ;;  %v511_v0 = vsel %vm274_vm8, %v4083_v38, %v4082_v5  ;;  %v4093_v40 = vld [vmem:[#allocation27_spill] sm:$0xff]  ;;  %v4101_v62 = vld [vmem:[#allocation30_spill] sm:$0xff] }
 0x429   :  { %v453_v19 = vadd.f32 %v448_v47, %v421_v60  ;;  %v563_v20 = vsel %vm561_vm9, %v4069_v35, %v4084_v54  ;;  %v484_v1 = vadd.f32 %v479_v34, %v452_v24  ;;  %v486_v31 = vadd.f32 %v4079_v6, %v454_v41  ;;  %v4099_v34 = vld [vmem:[#allocation29_spill] sm:$0xff] }
 0x42a   :  { %v603_v63 = vadd.f32 %v598_v27, %v567_v15  ;;  %v569_v36 = vadd.f32 %v4084_v54, %v390_v51  ;;  %v670_v29 = vsel %vm561_vm9, %v4086_v18, %v4085_v45  ;;  %v512_v61 = vsel %vm274_vm8, %v4082_v5, %v4087_v43 }
 0x42b   :  { %v485_v55 = vadd.f32 %v480_v26, %v453_v19  ;;  %v599_v3 = vsel %vm561_vm9, %v4075_v59, %v4088_v58  ;;  %v516_v12 = vadd.f32 %v511_v0, %v484_v1  ;;  %v568_v23 = vadd.f32 %v563_v20, %v389_v48  ;;  %v4097_v59 = vld [vmem:[#allocation56_spill] sm:$0xff]  ;;  %v4100_v48 = vld [vmem:[#allocation6_spill] sm:$0xff] }
 0x42c   :  { %v639_v14 = vadd.f32 %v634_v21, %v603_v63  ;;  %v605_v7 = vadd.f32 %v4088_v58, %v569_v36  ;;  %v702_v52 = vsel %vm561_vm9, %v4090_v44, %v4089_v13  ;;  %v635_v4 = vsel %vm561_vm9, %v4080_v11, %v4091_v57  ;;  %v4102_v21 = vld [vmem:[#allocation57_spill] sm:$0xff] }
 0x42d   :  { %v703_v2 = vsel %vm561_vm9, %v4089_v13, %v4092_v50  ;;  %v517_v22 = vadd.f32 %v512_v61, %v485_v55  ;;  %v518_v35 = vadd.f32 %v4087_v43, %v486_v31  ;;  %v604_v32 = vadd.f32 %v599_v3, %v568_v23 }
 0x42e   :  { %v675_v46 = vadd.f32 %v670_v29, %v639_v14  ;;  %v734_v49 = vsel %vm561_vm9, %v4094_v42, %v4093_v40  ;;  %v641_v28 = vadd.f32 %v4091_v57, %v605_v7  ;;  %v671_v9 = vsel %vm561_vm9, %v4085_v45, %v4095_v30 }
 0x42f   :  { %v707_v10 = vadd.f32 %v702_v52, %v516_v12  ;;  %v735_v16 = vsel %vm561_vm9, %v4093_v40, %v4096_v53  ;;  %v640_v47 = vadd.f32 %v635_v4, %v604_v32  ;;  %v708_v41 = vadd.f32 %v703_v2, %v517_v22 }
 0x430   :  { %v766_v27 = vsel %vm561_vm9, %v4098_v25, %v4097_v59  ;;  %v709_v33 = vadd.f32 %v4092_v50, %v518_v35  ;;  %v767_v15 = vsel %vm561_vm9, %v4097_v59, %v4099_v34  ;;  %v2128_v24 = vadd.f32 %v675_v46, %v4100_v48 }
 0x431   :  { %v739_v17 = vadd.f32 %v734_v49, %v707_v10  ;;  %v676_v6 = vadd.f32 %v671_v9, %v640_v47  ;;  %v677_v26 = vadd.f32 %v4095_v30, %v641_v28  ;;  %v740_v11 = vadd.f32 %v735_v16, %v708_v41 }
 0x432   :  { %v798_v19 = vsel %vm561_vm9, %v4102_v21, %v4101_v62  ;;  %v741_v54 = vadd.f32 %v4096_v53, %v709_v33 }
 0x433   :  { %v771_v5 = vadd.f32 %v766_v27, %v739_v17  ;;  %v772_v20 = vadd.f32 %v767_v15, %v740_v11  ;;  %v2130_v29 = vadd.f32 %v677_v26, %v4100_v48  ;;  %v2129_v55 = vadd.f32 %v676_v6, %v4100_v48 }
 0x434   :  { %v773_v61 = vadd.f32 %v4099_v34, %v741_v54 }
 0x435   :  { %v803_v31 = vadd.f32 %v798_v19, %v771_v5 }
 0x437   :  { %v2185_v7 = vadd.f32 %v803_v31, %v4100_v48 }
 0x46b   :  { %v2135_v39 = vpop.permute.xlu1 %2134 }
 0x46c   :  { %v2137_v8 = vpop.permute.xlu0 %2136 }
 0x46d   :  { %v2141_v51 = vsel %vm2140_vm11, %v2135_v39, %v2137_v8  ;;  %v4103_v39 = vld [vmem:[#allocation58_spill] sm:$0xff] }
 0x46e   :  { %v799_v38 = vsel %vm561_vm9, %v4101_v62, %v4103_v39  ;;  %v2146_v0 = vadd.f32 %v2141_v51, %v2128_v24  ;;  %v805_v52 = vadd.f32 %v4103_v39, %v773_v61 }
 0x46f   :  { %v804_v18 = vadd.f32 %v799_v38, %v772_v20 }
 0x470   :  { %v2139_v37 = vpop.permute.xlu1 %2138  ;;  %v2192_v56 = vpop.permute.xlu0 %2191  ;;  %v2187_v49 = vadd.f32 %v805_v52, %v4100_v48 }
 0x471   :  { %v2142_v36 = vsel %vm2140_vm11, %v2137_v8, %v2139_v37  ;;  %v2148_v3 = vadd.f32 %v2139_v37, %v2130_v29  ;;  %v2186_v57 = vadd.f32 %v804_v18, %v4100_v48 }
 0x472   :  { %v2147_v58 = vadd.f32 %v2142_v36, %v2129_v55 }
 0x474   :  { %v2194_v60 = vpop.permute.xlu1 %2193  ;;  %v2196_v63 = vpop.permute.xlu0 %2195 }
 0x475   :  { %v2197_v14 = vsel %vm2140_vm11, %v2192_v56, %v2194_v60  ;;  %v2198_v8 = vsel %vm2140_vm11, %v2194_v60, %v2196_v63  ;;  %v2204_v30 = vadd.f32 %v2196_v63, %v2187_v49 }
 0x476   :  { %v2202_v46 = vadd.f32 %v2197_v14, %v2185_v7  ;;  %v2203_v50 = vadd.f32 %v2198_v8, %v2186_v57 }
 0x484   :  { %v2153_v1 = vpop.permute.xlu1 %2152 }
 0x485   :  { %v2164_v45 = vadd.f32 %v2153_v1, %v2146_v0 }
 0x487   :  { %v2167_v43 = vmax.f32 %v2164_v45, 0.0 }
 0x488   :  { %v2157_v12 = vpop.permute.xlu1 %2156  ;;  %v2155_v23 = vpop.permute.xlu0 %2154 }
 0x489   :  { %v2159_v13 = vsel %vm2158_vm12, %v2153_v1, %v2155_v23  ;;  %v2160_v44 = vsel %vm2158_vm12, %v2155_v23, %v2157_v12  ;;  %2173 = vrot.lane.b32.xlu1 %v2167_v43, %s2393_s22 }
 0x48a   :  { %v2165_v4 = vadd.f32 %v2159_v13, %v2147_v58  ;;  %v2166_v37 = vadd.f32 %v2160_v44, %v2148_v3 }
 0x48c   :  { %v2168_v2 = vmax.f32 %v2165_v4, 0.0  ;;  %v2169_v22 = vmax.f32 %v2166_v37, 0.0  ;;  %v2211_v35 = vpop.permute.xlu1 %2210  ;;  %v2209_v32 = vpop.permute.xlu0 %2208 }
 0x48d   :  { %v2214_v40 = vsel %vm2158_vm12, %v2209_v32, %v2211_v35  ;;  %v2219_v42 = vadd.f32 %v2209_v32, %v2202_v46 }
 0x48e   :  { %v2220_v56 = vadd.f32 %v2214_v40, %v2203_v50  ;;  %2177 = vrot.lane.b32.xlu1 %v2169_v22, %s2393_s22  ;;  %2175 = vrot.lane.b32.xlu0 %v2168_v2, %s2393_s22 }
 0x48f   :  { %v2222_v28 = vmax.f32 %v2219_v42, 0.0 }
 0x490   :  { %v2223_v9 = vmax.f32 %v2220_v56, 0.0  ;;  %v2213_v10 = vpop.permute.xlu0 %2212 }
 0x491   :  { %v2215_v53 = vsel %vm2158_vm12, %v2211_v35, %v2213_v10 }
 0x492   :  { %v2221_v16 = vadd.f32 %v2215_v53, %v2204_v30  ;;  %2230 = vrot.lane.b32.xlu1 %v2223_v9, %s2393_s22  ;;  %2228 = vrot.lane.b32.xlu0 %v2222_v28, %s2393_s22 }
 0x494   :  { %v2224_v47 = vmax.f32 %v2221_v16, 0.0 }
 0x496   :  { %2232 = vrot.lane.b32.xlu0 %v2224_v47, %s2393_s22 }
 0x4fb   :  { %v2174_v41 = vpop.permute.xlu1 %2173 }
 0x500   :  { %v2178_v59 = vpop.permute.xlu1 %2177  ;;  %v2176_v25 = vpop.permute.xlu0 %2175 }
 0x501   :  { %v2179_v27 = vsel %vm1848_vm6, %v2174_v41, %v2176_v25  ;;  %v2180_v51 = vsel %vm1848_vm6, %v2176_v25, %v2178_v59 }
 0x502   :  { %2183 = vst [vmem:[%s3921_s3] sm:$0xff] %v2179_v27  ;;  %2184 = vst [vmem:[%s3921_s3 + $0x8] sm:$0xff] %v2180_v51 }
 0x504   :  { %v2231_v60 = vpop.permute.xlu1 %2230  ;;  %v2229_v33 = vpop.permute.xlu0 %2228 }
 0x505   :  { %v2234_v17 = vsel %vm1848_vm6, %v2229_v33, %v2231_v60 }
 0x506   :  { %2238 = vst [vmem:[%s3921_s3 + $0x10] sm:$0xff] %v2234_v17 }
 0x508   :  { %v2233_v34 = vpop.permute.xlu0 %2232 }
 0x509   :  { %v2235_v15 = vsel %vm1848_vm6, %v2231_v60, %v2233_v34 }
 0x50a   :  { %2239 = vst [vmem:[%s3921_s3 + $0x18] sm:$0xff] %v2235_v15 }

</bundles_post_ra>
